<compile_context>
chip_gen: v7x
topology: tpu7x:2x2x1
jax: 0.10.0
libtpu: 0.0.40
codegen_flags: <defaults>
</compile_context>

<pallas_src>
import math
import functools

import jax
import jax.numpy as jnp
from jax.experimental import pallas as pl
from jax.experimental.pallas import tpu as pltpu


# ----------------------------- fused ISAB kernel --------------------------------

def isab_kernel(i_ref, x_ref, bias_ref,
                wq0_ref, bq0_ref,
                wx_ref, bx_ref,          # packed [wk0*s | wv0 | wq1], biases
                wh_ref, bh_ref,          # packed [wk1*s | wv1], biases
                wo_ref, bo_ref,          # stacked (2, dV, dV) / (2, 1, dV)
                o_ref,
                px_ref, ph_ref,          # VMEM scratch for projected activations
                *, num_heads, num_inds, seq_len, batch_tile):
    """One batch tile of the full ISAB forward (mab0 then mab1).

    i_ref:    (num_inds, dV)      induced points I (shared across batch)
    x_ref:    (bt*N, dim_in)      flattened input set for this batch tile
    bias_ref: (bt, 1, N)          additive mask bias (0 keep / -1e10 drop)
    px_ref:   (bt, N, 3*dV)       scratch holding [Kp0 | Vp0 | Qp1]
    ph_ref:   (bt, ni, 2*dV)      scratch holding [Kp1 | Vp1]
    o_ref:    (bt*N, dV)
    """
    f32 = jnp.float32
    dV = wq0_ref.shape[1]
    ds = dV // num_heads
    bt, N, ni, H = batch_tile, seq_len, num_inds, num_heads

    def softmax_rows(s):
        m = jnp.max(s, axis=-1, keepdims=True)
        p = jnp.exp(s - m)
        return p * pl.reciprocal(jnp.sum(p, axis=-1, keepdims=True), approx=True)

    X = x_ref[...]                                           # (bt*N, dim_in)

    # ---- fused projections: single wide MXU matmuls ----
    Ip = jnp.dot(i_ref[...], wq0_ref[...],
                 preferred_element_type=f32) + bq0_ref[...]  # (ni, dV)
    PX = jnp.dot(X, wx_ref[...],
                 preferred_element_type=f32) + bx_ref[...]   # (bt*N, 3*dV)
    px_ref[...] = PX.reshape(bt, N, 3 * dV)                  # park in VMEM scratch

    # hoisted broadcasts (done once, reused by every head)
    Ipb = jnp.broadcast_to(Ip[None, :, :], (bt, ni, dV)).astype(f32)
    bias_full = jnp.broadcast_to(bias_ref[...], (bt, ni, N)).astype(f32)

    # -------- MAB0: Q = I (shared), K = V = X, masked --------
    heads0 = []
    for h in range(H):                                       # 4 static iterations
        c = h * ds
        qh = Ipb[:, :, c:c + ds]                             # (bt, ni, ds)
        kh = px_ref[:, :, c:c + ds]                          # (bt, N, ds)  Kp0 (pre-scaled)
        vh = px_ref[:, :, dV + c:dV + c + ds]                # (bt, N, ds)  Vp0
        s = jnp.einsum('bqd,bkd->bqk', qh, kh,
                       preferred_element_type=f32) + bias_full
        a = softmax_rows(s)
        heads0.append(qh + jnp.einsum('bqk,bkd->bqd', a, vh,
                                      preferred_element_type=f32))
    # ONE head->lane reassembly per MAB
    O0 = jnp.concatenate(heads0, axis=-1).reshape(bt * ni, dV)
    Hrep = O0 + jnp.maximum(
        jnp.dot(O0, wo_ref[0], preferred_element_type=f32) + bo_ref[0], 0.0)

    # -------- MAB1: Q = X, K = V = H, no mask --------
    PH = jnp.dot(Hrep, wh_ref[...],
                 preferred_element_type=f32) + bh_ref[...]   # (bt*ni, 2*dV)
    ph_ref[...] = PH.reshape(bt, ni, 2 * dV)

    heads1 = []
    for h in range(H):
        c = h * ds
        qh = px_ref[:, :, 2 * dV + c:2 * dV + c + ds]        # (bt, N, ds)  Qp1
        kh = ph_ref[:, :, c:c + ds]                          # (bt, ni, ds) Kp1 (pre-scaled)
        vh = ph_ref[:, :, dV + c:dV + c + ds]                # (bt, ni, ds) Vp1
        s = jnp.einsum('bqd,bkd->bqk', qh, kh, preferred_element_type=f32)
        a = softmax_rows(s)
        heads1.append(qh + jnp.einsum('bqk,bkd->bqd', a, vh,
                                      preferred_element_type=f32))
    O1 = jnp.concatenate(heads1, axis=-1).reshape(bt * N, dV)
    out = O1 + jnp.maximum(
        jnp.dot(O1, wo_ref[1], preferred_element_type=f32) + bo_ref[1], 0.0)
    o_ref[...] = out.astype(o_ref.dtype)


# ------------------------------ ISAB wrapper ----------------------------------

def isab_forward(X, mask, params, *, batch_tile=None, compute_dtype=jnp.float32):
    """X: (B, N, dim_in), mask: (B, N) float {0,1} or None. Returns (B, N, dim_out).

    compute_dtype: dtype fed to the projection MXU matmuls.  Use jnp.bfloat16 on
    v6e/v7x at production sizes (accumulation stays f32); f32 default keeps the
    toy-size numerics exact.
    """
    B, N, dim_in = X.shape
    p0, p1 = params["mab0"], params["mab1"]
    num_heads = p0["num_heads"]
    I = params["I"][0]                                   # (num_inds, dV)
    num_inds, dV = I.shape
    assert dV % num_heads == 0

    if batch_tile is None:
        # Prefer >=2 grid steps so both v7x TensorCores get work on the
        # "parallel" batch axis; cap the tile so activation slabs stay a small
        # fraction of v7x's 64 MiB VMEM.
        batch_tile = max(1, B // 2) if B > 1 else 1
        batch_tile = min(batch_tile, 8)
    assert B % batch_tile == 0, "B must be divisible by batch_tile"
    grid = (B // batch_tile,)

    scale = 1.0 / math.sqrt(dV)
    ds = dV // num_heads

    # additive mask bias, computed once (0 for keep, -1e10 for masked)
    if mask is None:
        bias = jnp.zeros((B, 1, N), jnp.float32)
    else:
        bias = jnp.where(mask.reshape(B, 1, N) > 0.5, 0.0, -1e10).astype(jnp.float32)

    # ---- parameter packing (one-time constant folds) ----
    # Everything multiplying X fused into one (dim_in, 3*dV) slab, with
    # 1/sqrt(dV) folded into the K columns; likewise for everything multiplying H.
    WX = jnp.concatenate([p0["wk"] * scale, p0["wv"], p1["wq"]], axis=1)
    BX = jnp.concatenate([p0["bk"] * scale, p0["bv"], p1["bq"]], axis=1)
    WH = jnp.concatenate([p1["wk"] * scale, p1["wv"]], axis=1)
    BH = jnp.concatenate([p1["bk"] * scale, p1["bv"]], axis=1)
    WO = jnp.stack([p0["wo"], p1["wo"]], axis=0)            # (2, dV, dV)
    BO = jnp.stack([p0["bo"], p1["bo"]], axis=0)            # (2, 1, dV)
    WQ0, BQ0 = p0["wq"], p0["bq"]

    X_flat = X.reshape(B * N, dim_in).astype(compute_dtype)
    I_in = I.astype(compute_dtype)
    WX_in, WH_in, WQ0_in = (WX.astype(compute_dtype), WH.astype(compute_dtype),
                            WQ0.astype(compute_dtype))

    def const_spec(shape):
        # Weight/bias inputs: block index never changes across the grid.
        return pl.BlockSpec(shape, lambda b: (0,) * len(shape))

    kernel = functools.partial(isab_kernel, num_heads=num_heads,
                               num_inds=num_inds, seq_len=N,
                               batch_tile=batch_tile)

    # Advisory cost estimate so XLA schedules surrounding ops sensibly.
    mm = lambda m, k, n: 2 * m * k * n
    flops_per_sample = (
        mm(N, dim_in, 3 * dV) + mm(num_inds, dV, dV) + mm(num_inds, dV, 2 * dV)
        + num_heads * (mm(num_inds, ds, N) + mm(num_inds, N, ds))
        + num_heads * (mm(N, ds, num_inds) + mm(N, num_inds, ds))
        + mm(num_inds, dV, dV) + mm(N, dV, dV))
    param_bytes = sum(int(a.size) * a.dtype.itemsize
                      for a in (I_in, WQ0_in, BQ0, WX_in, BX, WH_in, BH, WO, BO))
    cost = pl.CostEstimate(
        flops=int(B * flops_per_sample),
        transcendentals=int(2 * B * num_heads * num_inds * N),
        bytes_accessed=int(X_flat.size * X_flat.dtype.itemsize
                           + B * N * dV * 4 + int(bias.size) * 4
                           + grid[0] * param_bytes))

    out_flat = pl.pallas_call(
        kernel,
        out_shape=jax.ShapeDtypeStruct((B * N, dV), jnp.float32),
        grid_spec=pltpu.PrefetchScalarGridSpec(
            num_scalar_prefetch=0,
            grid=grid,
            in_specs=[
                const_spec((num_inds, dV)),                                   # I
                pl.BlockSpec((batch_tile * N, dim_in), lambda b: (b, 0)),     # X (flattened)
                pl.BlockSpec((batch_tile, 1, N), lambda b: (b, 0, 0)),        # mask bias
                const_spec((dV, dV)), const_spec((1, dV)),                    # wq0, bq0
                const_spec((dim_in, 3 * dV)), const_spec((1, 3 * dV)),        # WX, BX
                const_spec((dV, 2 * dV)), const_spec((1, 2 * dV)),            # WH, BH
                const_spec((2, dV, dV)), const_spec((2, 1, dV)),              # WO, BO
            ],
            out_specs=pl.BlockSpec((batch_tile * N, dV), lambda b: (b, 0)),
            scratch_shapes=[
                pltpu.VMEM((batch_tile, N, 3 * dV), jnp.float32),             # [Kp0|Vp0|Qp1]
                pltpu.VMEM((batch_tile, num_inds, 2 * dV), jnp.float32),      # [Kp1|Vp1]
            ],
        ),
        compiler_params=pltpu.CompilerParams(
            dimension_semantics=("parallel",),
            vmem_limit_bytes=32 * 1024 * 1024),
        cost_estimate=cost,
    )(I_in, X_flat, bias, WQ0_in, BQ0, WX_in, BX, WH_in, BH, WO, BO)

    return out_flat.reshape(B, N, dV)


# --------------------------- parameter init (deterministic) -------------------

def init_linear(key, din, dout):
    k1, k2 = jax.random.split(key)
    bound = 1.0 / math.sqrt(din)
    w = jax.random.uniform(k1, (din, dout), jnp.float32, -bound, bound)
    b = jax.random.uniform(k2, (1, dout), jnp.float32, -bound, bound)
    return w, b


def init_mab(key, dim_Q, dim_K, dim_V, num_heads):
    ks = jax.random.split(key, 4)
    wq, bq = init_linear(ks[0], dim_Q, dim_V)
    wk, bk = init_linear(ks[1], dim_K, dim_V)
    wv, bv = init_linear(ks[2], dim_K, dim_V)
    wo, bo = init_linear(ks[3], dim_V, dim_V)
    return dict(wq=wq, bq=bq, wk=wk, bk=bk, wv=wv, bv=bv, wo=wo, bo=bo,
                num_heads=num_heads)


def init_isab(key, dim_in, dim_out, num_heads, num_inds):
    k0, k1, k2 = jax.random.split(key, 3)
    # xavier_uniform for I of shape (1, num_inds, dim_out)
    fan_in, fan_out = num_inds * dim_out, dim_out
    limit = math.sqrt(6.0 / (fan_in + fan_out))
    I = jax.random.uniform(k0, (1, num_inds, dim_out), jnp.float32, -limit, limit)
    return dict(
        I=I,
        mab0=init_mab(k1, dim_out, dim_in, dim_out, num_heads),
        mab1=init_mab(k2, dim_in, dim_out, dim_out, num_heads),
    )


# ------------------------------ pure-JAX reference ----------------------------

def mab_ref(Q, K, mask, p):
    Qp = Q @ p["wq"] + p["bq"]
    Kp = K @ p["wk"] + p["bk"]
    Vp = K @ p["wv"] + p["bv"]
    B, Lq, dV = Qp.shape
    Lk = K.shape[1]
    H = p["num_heads"]
    ds = dV // H
    Qh = Qp.reshape(B, Lq, H, ds).transpose(0, 2, 1, 3)
    Kh = Kp.reshape(B, Lk, H, ds).transpose(0, 2, 1, 3)
    Vh = Vp.reshape(B, Lk, H, ds).transpose(0, 2, 1, 3)
    s = jnp.einsum("bhqd,bhkd->bhqk", Qh, Kh) / math.sqrt(dV)
    if mask is not None:
        s = jnp.where(mask[:, None, None, :] > 0.5, s, -1e10)
    a = jax.nn.softmax(s, axis=-1)
    o = Qh + jnp.einsum("bhqk,bhkd->bhqd", a, Vh)
    O = o.transpose(0, 2, 1, 3).reshape(B, Lq, dV)
    return O + jax.nn.relu(O @ p["wo"] + p["bo"])


def isab_ref(X, mask, params):
    B = X.shape[0]
    I = jnp.broadcast_to(params["I"], (B,) + params["I"].shape[1:])
    H = mab_ref(I, X, mask, params["mab0"])
    return mab_ref(X, H, None, params["mab1"])


# ----------------------------------- main -------------------------------------

if __name__ == "__main__":
    B, N = 2, 16
    dim_in, dim_out, num_heads, num_inds = 8, 32, 4, 8

    key = jax.random.PRNGKey(0)
    kx, kp = jax.random.split(key)
    X = jax.random.normal(kx, (B, N, dim_in), jnp.float32)
    lengths = jnp.array([12, 16], dtype=jnp.int32)
    mask = (jnp.arange(N)[None, :] < lengths[:, None]).astype(jnp.float32)  # (B, N)

    params = init_isab(kp, dim_in, dim_out, num_heads, num_inds)

    out = isab_forward(X, mask, params)
    out = jax.block_until_ready(out)

    ref = isab_ref(X, mask, params)
    assert out.shape == (B, N, dim_out)
    # tolerance relaxed slightly because of pl.reciprocal(approx=True) in the softmax
    max_err = float(jnp.max(jnp.abs(out - ref)))
    assert jnp.allclose(out, ref, atol=1e-2, rtol=1e-2), \
        f"mismatch vs JAX reference (max abs err={max_err})"

    print("KERNEL_OK")
</pallas_src>

<mosaic_0001>
module attributes {stable_mosaic.version = 11 : i64} {
  func.func @isab_kernel(%arg0: i32, %arg1: memref<8x32xf32, #tpu.memory_space<vmem>>, %arg2: memref<16x8xf32, #tpu.memory_space<vmem>>, %arg3: memref<1x1x16xf32, #tpu.memory_space<vmem>>, %arg4: memref<32x32xf32, #tpu.memory_space<vmem>>, %arg5: memref<1x32xf32, #tpu.memory_space<vmem>>, %arg6: memref<8x96xf32, #tpu.memory_space<vmem>>, %arg7: memref<1x96xf32, #tpu.memory_space<vmem>>, %arg8: memref<32x64xf32, #tpu.memory_space<vmem>>, %arg9: memref<1x64xf32, #tpu.memory_space<vmem>>, %arg10: memref<2x32x32xf32, #tpu.memory_space<vmem>>, %arg11: memref<2x1x32xf32, #tpu.memory_space<vmem>>, %arg12: memref<16x32xf32, #tpu.memory_space<vmem>>, %arg13: memref<1x16x96xf32, #tpu.memory_space<vmem>>, %arg14: memref<1x8x64xf32, #tpu.memory_space<vmem>>) attributes {dimension_semantics = [#tpu.dimension_semantics<parallel>], iteration_bounds = array<i64: 2>, scalar_prefetch = 0 : i64, scratch_operands = 2 : i64, tpu.core_type = #tpu.core_type<tc>, window_params = [{pipeline_mode = #tpu.pipeline_mode<synchronous>, transform_indices = @transform_0, window_bounds = array<i64: 8, 32>}, {transform_indices = @transform_1, window_bounds = array<i64: 16, 8>}, {transform_indices = @transform_2, window_bounds = array<i64: 1, 1, 16>}, {pipeline_mode = #tpu.pipeline_mode<synchronous>, transform_indices = @transform_3, window_bounds = array<i64: 32, 32>}, {pipeline_mode = #tpu.pipeline_mode<synchronous>, transform_indices = @transform_4, window_bounds = array<i64: 1, 32>}, {pipeline_mode = #tpu.pipeline_mode<synchronous>, transform_indices = @transform_5, window_bounds = array<i64: 8, 96>}, {pipeline_mode = #tpu.pipeline_mode<synchronous>, transform_indices = @transform_6, window_bounds = array<i64: 1, 96>}, {pipeline_mode = #tpu.pipeline_mode<synchronous>, transform_indices = @transform_7, window_bounds = array<i64: 32, 64>}, {pipeline_mode = #tpu.pipeline_mode<synchronous>, transform_indices = @transform_8, window_bounds = array<i64: 1, 64>}, {pipeline_mode = #tpu.pipeline_mode<synchronous>, transform_indices = @transform_9, window_bounds = array<i64: 2, 32, 32>}, {pipeline_mode = #tpu.pipeline_mode<synchronous>, transform_indices = @transform_10, window_bounds = array<i64: 2, 1, 32>}, {transform_indices = @transform_11, window_bounds = array<i64: 16, 32>}]} {
    %c0 = arith.constant 0 : index
    %c0_0 = arith.constant 0 : index
    %0 = vector.load %arg2[%c0, %c0_0] : memref<16x8xf32, #tpu.memory_space<vmem>>, vector<16x8xf32>
    %c0_1 = arith.constant 0 : index
    %c0_2 = arith.constant 0 : index
    %1 = vector.load %arg1[%c0_1, %c0_2] : memref<8x32xf32, #tpu.memory_space<vmem>>, vector<8x32xf32>
    %c0_3 = arith.constant 0 : index
    %c0_4 = arith.constant 0 : index
    %2 = vector.load %arg4[%c0_3, %c0_4] : memref<32x32xf32, #tpu.memory_space<vmem>>, vector<32x32xf32>
    %cst = arith.constant dense<0.000000e+00> : vector<8x32xf32>
    %3 = tpu.matmul %1, %2, %cst {dimension_numbers = #tpu.dot_dimension_numbers<[1], [0], [0], [1], [0, 0, 1, 1], [], []>} : vector<8x32xf32>, vector<32x32xf32>, vector<8x32xf32> -> vector<8x32xf32>
    %c0_5 = arith.constant 0 : index
    %c0_6 = arith.constant 0 : index
    %4 = vector.load %arg5[%c0_5, %c0_6] : memref<1x32xf32, #tpu.memory_space<vmem>>, vector<1x32xf32>
    %5 = vector.broadcast %4 : vector<1x32xf32> to vector<8x32xf32>
    %6 = arith.addf %3, %5 : vector<8x32xf32>
    %c0_7 = arith.constant 0 : index
    %c0_8 = arith.constant 0 : index
    %7 = vector.load %arg6[%c0_7, %c0_8] : memref<8x96xf32, #tpu.memory_space<vmem>>, vector<8x96xf32>
    %cst_9 = arith.constant dense<0.000000e+00> : vector<16x96xf32>
    %8 = tpu.matmul %0, %7, %cst_9 {dimension_numbers = #tpu.dot_dimension_numbers<[1], [0], [0], [1], [0, 0, 1, 1], [], []>} : vector<16x8xf32>, vector<8x96xf32>, vector<16x96xf32> -> vector<16x96xf32>
    %c0_10 = arith.constant 0 : index
    %c0_11 = arith.constant 0 : index
    %9 = vector.load %arg7[%c0_10, %c0_11] : memref<1x96xf32, #tpu.memory_space<vmem>>, vector<1x96xf32>
    %10 = vector.broadcast %9 : vector<1x96xf32> to vector<16x96xf32>
    %11 = arith.addf %8, %10 : vector<16x96xf32>
    %12 = vector.shape_cast %11 : vector<16x96xf32> to vector<1x16x96xf32>
    %c0_12 = arith.constant 0 : index
    %c0_13 = arith.constant 0 : index
    %c0_14 = arith.constant 0 : index
    %13 = vector.load %arg13[%c0_12, %c0_13, %c0_14] : memref<1x16x96xf32, #tpu.memory_space<vmem>>, vector<1x16x96xf32>
    tpu.vector_store %arg13[%c0_12, %c0_13, %c0_14], %12 {strides = array<i32>} : memref<1x16x96xf32, #tpu.memory_space<vmem>>, vector<1x16x96xf32>,
    %14 = vector.shape_cast %6 : vector<8x32xf32> to vector<1x8x32xf32>
    %c0_15 = arith.constant 0 : index
    %c0_16 = arith.constant 0 : index
    %c0_17 = arith.constant 0 : index
    %15 = vector.load %arg3[%c0_15, %c0_16, %c0_17] : memref<1x1x16xf32, #tpu.memory_space<vmem>>, vector<1x1x16xf32>
    %16 = vector.shape_cast %15 : vector<1x1x16xf32> to vector<1x1x16xf32>
    %17 = vector.broadcast %16 : vector<1x1x16xf32> to vector<1x8x16xf32>
    %18 = vector.extract_strided_slice %14 {offsets = [0, 0, 0], sizes = [1, 8, 8], strides = [1, 1, 1]} : vector<1x8x32xf32> to vector<1x8x8xf32>
    %c0_18 = arith.constant 0 : index
    %c0_19 = arith.constant 0 : index
    %c0_20 = arith.constant 0 : index
    %19 = vector.load %arg13[%c0_18, %c0_19, %c0_20] : memref<1x16x96xf32, #tpu.memory_space<vmem>>, vector<1x16x8xf32>
    %c0_21 = arith.constant 0 : index
    %c0_22 = arith.constant 0 : index
    %c32 = arith.constant 32 : index
    %20 = vector.load %arg13[%c0_21, %c0_22, %c32] : memref<1x16x96xf32, #tpu.memory_space<vmem>>, vector<1x16x8xf32>
    "tpu.trace_start"() <{level = 10 : i32, message = "bqd,bkd->bqk"}> : () -> ()
    %cst_23 = arith.constant dense<0.000000e+00> : vector<1x8x16xf32>
    %21 = tpu.matmul %18, %19, %cst_23 {dimension_numbers = #tpu.dot_dimension_numbers<[2], [2], [1], [1], [0, 0, 0, 1, 1, 1], [0], [0]>} : vector<1x8x8xf32>, vector<1x16x8xf32>, vector<1x8x16xf32> -> vector<1x8x16xf32>
    "tpu.trace_stop"() : () -> ()
    %22 = arith.addf %21, %17 : vector<1x8x16xf32>
    %cst_24 = arith.constant dense<0xFF800000> : vector<1x8xf32>
    %23 = vector.multi_reduction <maximumf>, %22, %cst_24 [2] : vector<1x8x16xf32> to vector<1x8xf32>
    %24 = vector.shape_cast %23 : vector<1x8xf32> to vector<1x8x1xf32>
    %25 = vector.broadcast %24 : vector<1x8x1xf32> to vector<1x8x16xf32>
    %26 = arith.subf %22, %25 : vector<1x8x16xf32>
    %27 = math.exp %26 : vector<1x8x16xf32>
    %cst_25 = arith.constant dense<0.000000e+00> : vector<1x8xf32>
    %28 = vector.multi_reduction <add>, %27, %cst_25 [2] : vector<1x8x16xf32> to vector<1x8xf32>
    %29 = vector.shape_cast %28 : vector<1x8xf32> to vector<1x8x1xf32>
    %30 = tpu.reciprocal %29 {approx = true} : vector<1x8x1xf32> -> vector<1x8x1xf32>
    %31 = vector.broadcast %30 : vector<1x8x1xf32> to vector<1x8x16xf32>
    %32 = arith.mulf %27, %31 : vector<1x8x16xf32>
    "tpu.trace_start"() <{level = 10 : i32, message = "bqk,bkd->bqd"}> : () -> ()
    %cst_26 = arith.constant dense<0.000000e+00> : vector<1x8x8xf32>
    %33 = tpu.matmul %32, %20, %cst_26 {dimension_numbers = #tpu.dot_dimension_numbers<[2], [1], [1], [2], [0, 0, 0, 1, 1, 2], [0], [0]>} : vector<1x8x16xf32>, vector<1x16x8xf32>, vector<1x8x8xf32> -> vector<1x8x8xf32>
    "tpu.trace_stop"() : () -> ()
    %34 = arith.addf %18, %33 : vector<1x8x8xf32>
    %35 = vector.extract_strided_slice %14 {offsets = [0, 0, 8], sizes = [1, 8, 8], strides = [1, 1, 1]} : vector<1x8x32xf32> to vector<1x8x8xf32>
    %c0_27 = arith.constant 0 : index
    %c0_28 = arith.constant 0 : index
    %c8 = arith.constant 8 : index
    %36 = vector.load %arg13[%c0_27, %c0_28, %c8] : memref<1x16x96xf32, #tpu.memory_space<vmem>>, vector<1x16x8xf32>
    %c0_29 = arith.constant 0 : index
    %c0_30 = arith.constant 0 : index
    %c40 = arith.constant 40 : index
    %37 = vector.load %arg13[%c0_29, %c0_30, %c40] : memref<1x16x96xf32, #tpu.memory_space<vmem>>, vector<1x16x8xf32>
    "tpu.trace_start"() <{level = 10 : i32, message = "bqd,bkd->bqk"}> : () -> ()
    %cst_31 = arith.constant dense<0.000000e+00> : vector<1x8x16xf32>
    %38 = tpu.matmul %35, %36, %cst_31 {dimension_numbers = #tpu.dot_dimension_numbers<[2], [2], [1], [1], [0, 0, 0, 1, 1, 1], [0], [0]>} : vector<1x8x8xf32>, vector<1x16x8xf32>, vector<1x8x16xf32> -> vector<1x8x16xf32>
    "tpu.trace_stop"() : () -> ()
    %39 = arith.addf %38, %17 : vector<1x8x16xf32>
    %cst_32 = arith.constant dense<0xFF800000> : vector<1x8xf32>
    %40 = vector.multi_reduction <maximumf>, %39, %cst_32 [2] : vector<1x8x16xf32> to vector<1x8xf32>
    %41 = vector.shape_cast %40 : vector<1x8xf32> to vector<1x8x1xf32>
    %42 = vector.broadcast %41 : vector<1x8x1xf32> to vector<1x8x16xf32>
    %43 = arith.subf %39, %42 : vector<1x8x16xf32>
    %44 = math.exp %43 : vector<1x8x16xf32>
    %cst_33 = arith.constant dense<0.000000e+00> : vector<1x8xf32>
    %45 = vector.multi_reduction <add>, %44, %cst_33 [2] : vector<1x8x16xf32> to vector<1x8xf32>
    %46 = vector.shape_cast %45 : vector<1x8xf32> to vector<1x8x1xf32>
    %47 = tpu.reciprocal %46 {approx = true} : vector<1x8x1xf32> -> vector<1x8x1xf32>
    %48 = vector.broadcast %47 : vector<1x8x1xf32> to vector<1x8x16xf32>
    %49 = arith.mulf %44, %48 : vector<1x8x16xf32>
    "tpu.trace_start"() <{level = 10 : i32, message = "bqk,bkd->bqd"}> : () -> ()
    %cst_34 = arith.constant dense<0.000000e+00> : vector<1x8x8xf32>
    %50 = tpu.matmul %49, %37, %cst_34 {dimension_numbers = #tpu.dot_dimension_numbers<[2], [1], [1], [2], [0, 0, 0, 1, 1, 2], [0], [0]>} : vector<1x8x16xf32>, vector<1x16x8xf32>, vector<1x8x8xf32> -> vector<1x8x8xf32>
    "tpu.trace_stop"() : () -> ()
    %51 = arith.addf %35, %50 : vector<1x8x8xf32>
    %52 = vector.extract_strided_slice %14 {offsets = [0, 0, 16], sizes = [1, 8, 8], strides = [1, 1, 1]} : vector<1x8x32xf32> to vector<1x8x8xf32>
    %c0_35 = arith.constant 0 : index
    %c0_36 = arith.constant 0 : index
    %c16 = arith.constant 16 : index
    %53 = vector.load %arg13[%c0_35, %c0_36, %c16] : memref<1x16x96xf32, #tpu.memory_space<vmem>>, vector<1x16x8xf32>
    %c0_37 = arith.constant 0 : index
    %c0_38 = arith.constant 0 : index
    %c48 = arith.constant 48 : index
    %54 = vector.load %arg13[%c0_37, %c0_38, %c48] : memref<1x16x96xf32, #tpu.memory_space<vmem>>, vector<1x16x8xf32>
    "tpu.trace_start"() <{level = 10 : i32, message = "bqd,bkd->bqk"}> : () -> ()
    %cst_39 = arith.constant dense<0.000000e+00> : vector<1x8x16xf32>
    %55 = tpu.matmul %52, %53, %cst_39 {dimension_numbers = #tpu.dot_dimension_numbers<[2], [2], [1], [1], [0, 0, 0, 1, 1, 1], [0], [0]>} : vector<1x8x8xf32>, vector<1x16x8xf32>, vector<1x8x16xf32> -> vector<1x8x16xf32>
    "tpu.trace_stop"() : () -> ()
    %56 = arith.addf %55, %17 : vector<1x8x16xf32>
    %cst_40 = arith.constant dense<0xFF800000> : vector<1x8xf32>
    %57 = vector.multi_reduction <maximumf>, %56, %cst_40 [2] : vector<1x8x16xf32> to vector<1x8xf32>
    %58 = vector.shape_cast %57 : vector<1x8xf32> to vector<1x8x1xf32>
    %59 = vector.broadcast %58 : vector<1x8x1xf32> to vector<1x8x16xf32>
    %60 = arith.subf %56, %59 : vector<1x8x16xf32>
    %61 = math.exp %60 : vector<1x8x16xf32>
    %cst_41 = arith.constant dense<0.000000e+00> : vector<1x8xf32>
    %62 = vector.multi_reduction <add>, %61, %cst_41 [2] : vector<1x8x16xf32> to vector<1x8xf32>
    %63 = vector.shape_cast %62 : vector<1x8xf32> to vector<1x8x1xf32>
    %64 = tpu.reciprocal %63 {approx = true} : vector<1x8x1xf32> -> vector<1x8x1xf32>
    %65 = vector.broadcast %64 : vector<1x8x1xf32> to vector<1x8x16xf32>
    %66 = arith.mulf %61, %65 : vector<1x8x16xf32>
    "tpu.trace_start"() <{level = 10 : i32, message = "bqk,bkd->bqd"}> : () -> ()
    %cst_42 = arith.constant dense<0.000000e+00> : vector<1x8x8xf32>
    %67 = tpu.matmul %66, %54, %cst_42 {dimension_numbers = #tpu.dot_dimension_numbers<[2], [1], [1], [2], [0, 0, 0, 1, 1, 2], [0], [0]>} : vector<1x8x16xf32>, vector<1x16x8xf32>, vector<1x8x8xf32> -> vector<1x8x8xf32>
    "tpu.trace_stop"() : () -> ()
    %68 = arith.addf %52, %67 : vector<1x8x8xf32>
    %69 = vector.extract_strided_slice %14 {offsets = [0, 0, 24], sizes = [1, 8, 8], strides = [1, 1, 1]} : vector<1x8x32xf32> to vector<1x8x8xf32>
    %c0_43 = arith.constant 0 : index
    %c0_44 = arith.constant 0 : index
    %c24 = arith.constant 24 : index
    %70 = vector.load %arg13[%c0_43, %c0_44, %c24] : memref<1x16x96xf32, #tpu.memory_space<vmem>>, vector<1x16x8xf32>
    %c0_45 = arith.constant 0 : index
    %c0_46 = arith.constant 0 : index
    %c56 = arith.constant 56 : index
    %71 = vector.load %arg13[%c0_45, %c0_46, %c56] : memref<1x16x96xf32, #tpu.memory_space<vmem>>, vector<1x16x8xf32>
    "tpu.trace_start"() <{level = 10 : i32, message = "bqd,bkd->bqk"}> : () -> ()
    %cst_47 = arith.constant dense<0.000000e+00> : vector<1x8x16xf32>
    %72 = tpu.matmul %69, %70, %cst_47 {dimension_numbers = #tpu.dot_dimension_numbers<[2], [2], [1], [1], [0, 0, 0, 1, 1, 1], [0], [0]>} : vector<1x8x8xf32>, vector<1x16x8xf32>, vector<1x8x16xf32> -> vector<1x8x16xf32>
    "tpu.trace_stop"() : () -> ()
    %73 = arith.addf %72, %17 : vector<1x8x16xf32>
    %cst_48 = arith.constant dense<0xFF800000> : vector<1x8xf32>
    %74 = vector.multi_reduction <maximumf>, %73, %cst_48 [2] : vector<1x8x16xf32> to vector<1x8xf32>
    %75 = vector.shape_cast %74 : vector<1x8xf32> to vector<1x8x1xf32>
    %76 = vector.broadcast %75 : vector<1x8x1xf32> to vector<1x8x16xf32>
    %77 = arith.subf %73, %76 : vector<1x8x16xf32>
    %78 = math.exp %77 : vector<1x8x16xf32>
    %cst_49 = arith.constant dense<0.000000e+00> : vector<1x8xf32>
    %79 = vector.multi_reduction <add>, %78, %cst_49 [2] : vector<1x8x16xf32> to vector<1x8xf32>
    %80 = vector.shape_cast %79 : vector<1x8xf32> to vector<1x8x1xf32>
    %81 = tpu.reciprocal %80 {approx = true} : vector<1x8x1xf32> -> vector<1x8x1xf32>
    %82 = vector.broadcast %81 : vector<1x8x1xf32> to vector<1x8x16xf32>
    %83 = arith.mulf %78, %82 : vector<1x8x16xf32>
    "tpu.trace_start"() <{level = 10 : i32, message = "bqk,bkd->bqd"}> : () -> ()
    %cst_50 = arith.constant dense<0.000000e+00> : vector<1x8x8xf32>
    %84 = tpu.matmul %83, %71, %cst_50 {dimension_numbers = #tpu.dot_dimension_numbers<[2], [1], [1], [2], [0, 0, 0, 1, 1, 2], [0], [0]>} : vector<1x8x16xf32>, vector<1x16x8xf32>, vector<1x8x8xf32> -> vector<1x8x8xf32>
    "tpu.trace_stop"() : () -> ()
    %85 = arith.addf %69, %84 : vector<1x8x8xf32>
    %86 = tpu.concatenate %34, %51, %68, %85 in 2 : vector<1x8x8xf32>, vector<1x8x8xf32>, vector<1x8x8xf32>, vector<1x8x8xf32> -> vector<1x8x32xf32>
    %87 = vector.shape_cast %86 : vector<1x8x32xf32> to vector<8x32xf32>
    %c0_51 = arith.constant 0 : index
    %c0_52 = arith.constant 0 : index
    %c0_53 = arith.constant 0 : index
    %88 = vector.load %arg10[%c0_51, %c0_52, %c0_53] : memref<2x32x32xf32, #tpu.memory_space<vmem>>, vector<1x32x32xf32>
    %89 = vector.shape_cast %88 : vector<1x32x32xf32> to vector<32x32xf32>
    %cst_54 = arith.constant dense<0.000000e+00> : vector<8x32xf32>
    %90 = tpu.matmul %87, %89, %cst_54 {dimension_numbers = #tpu.dot_dimension_numbers<[1], [0], [0], [1], [0, 0, 1, 1], [], []>} : vector<8x32xf32>, vector<32x32xf32>, vector<8x32xf32> -> vector<8x32xf32>
    %c0_55 = arith.constant 0 : index
    %c0_56 = arith.constant 0 : index
    %c0_57 = arith.constant 0 : index
    %91 = vector.load %arg11[%c0_55, %c0_56, %c0_57] : memref<2x1x32xf32, #tpu.memory_space<vmem>>, vector<1x1x32xf32>
    %92 = vector.shape_cast %91 : vector<1x1x32xf32> to vector<1x32xf32>
    %93 = vector.broadcast %92 : vector<1x32xf32> to vector<8x32xf32>
    %94 = arith.addf %90, %93 : vector<8x32xf32>
    %cst_58 = arith.constant 0.000000e+00 : f32
    %95 = vector.broadcast %cst_58 : f32 to vector<8x32xf32>
    %96 = arith.maximumf %94, %95 : vector<8x32xf32>
    %97 = arith.addf %87, %96 : vector<8x32xf32>
    %c0_59 = arith.constant 0 : index
    %c0_60 = arith.constant 0 : index
    %98 = vector.load %arg8[%c0_59, %c0_60] : memref<32x64xf32, #tpu.memory_space<vmem>>, vector<32x64xf32>
    %cst_61 = arith.constant dense<0.000000e+00> : vector<8x64xf32>
    %99 = tpu.matmul %97, %98, %cst_61 {dimension_numbers = #tpu.dot_dimension_numbers<[1], [0], [0], [1], [0, 0, 1, 1], [], []>} : vector<8x32xf32>, vector<32x64xf32>, vector<8x64xf32> -> vector<8x64xf32>
    %c0_62 = arith.constant 0 : index
    %c0_63 = arith.constant 0 : index
    %100 = vector.load %arg9[%c0_62, %c0_63] : memref<1x64xf32, #tpu.memory_space<vmem>>, vector<1x64xf32>
    %101 = vector.broadcast %100 : vector<1x64xf32> to vector<8x64xf32>
    %102 = arith.addf %99, %101 : vector<8x64xf32>
    %103 = vector.shape_cast %102 : vector<8x64xf32> to vector<1x8x64xf32>
    %c0_64 = arith.constant 0 : index
    %c0_65 = arith.constant 0 : index
    %c0_66 = arith.constant 0 : index
    %104 = vector.load %arg14[%c0_64, %c0_65, %c0_66] : memref<1x8x64xf32, #tpu.memory_space<vmem>>, vector<1x8x64xf32>
    tpu.vector_store %arg14[%c0_64, %c0_65, %c0_66], %103 {strides = array<i32>} : memref<1x8x64xf32, #tpu.memory_space<vmem>>, vector<1x8x64xf32>,
    %c0_67 = arith.constant 0 : index
    %c0_68 = arith.constant 0 : index
    %c64 = arith.constant 64 : index
    %105 = vector.load %arg13[%c0_67, %c0_68, %c64] : memref<1x16x96xf32, #tpu.memory_space<vmem>>, vector<1x16x8xf32>
    %c0_69 = arith.constant 0 : index
    %c0_70 = arith.constant 0 : index
    %c0_71 = arith.constant 0 : index
    %106 = vector.load %arg14[%c0_69, %c0_70, %c0_71] : memref<1x8x64xf32, #tpu.memory_space<vmem>>, vector<1x8x8xf32>
    %c0_72 = arith.constant 0 : index
    %c0_73 = arith.constant 0 : index
    %c32_74 = arith.constant 32 : index
    %107 = vector.load %arg14[%c0_72, %c0_73, %c32_74] : memref<1x8x64xf32, #tpu.memory_space<vmem>>, vector<1x8x8xf32>
    "tpu.trace_start"() <{level = 10 : i32, message = "bqd,bkd->bqk"}> : () -> ()
    %cst_75 = arith.constant dense<0.000000e+00> : vector<1x16x8xf32>
    %108 = tpu.matmul %105, %106, %cst_75 {dimension_numbers = #tpu.dot_dimension_numbers<[2], [2], [1], [1], [0, 0, 0, 1, 1, 1], [0], [0]>} : vector<1x16x8xf32>, vector<1x8x8xf32>, vector<1x16x8xf32> -> vector<1x16x8xf32>
    "tpu.trace_stop"() : () -> ()
    %cst_76 = arith.constant dense<0xFF800000> : vector<1x16xf32>
    %109 = vector.multi_reduction <maximumf>, %108, %cst_76 [2] : vector<1x16x8xf32> to vector<1x16xf32>
    %110 = vector.shape_cast %109 : vector<1x16xf32> to vector<1x16x1xf32>
    %111 = vector.broadcast %110 : vector<1x16x1xf32> to vector<1x16x8xf32>
    %112 = arith.subf %108, %111 : vector<1x16x8xf32>
    %113 = math.exp %112 : vector<1x16x8xf32>
    %cst_77 = arith.constant dense<0.000000e+00> : vector<1x16xf32>
    %114 = vector.multi_reduction <add>, %113, %cst_77 [2] : vector<1x16x8xf32> to vector<1x16xf32>
    %115 = vector.shape_cast %114 : vector<1x16xf32> to vector<1x16x1xf32>
    %116 = tpu.reciprocal %115 {approx = true} : vector<1x16x1xf32> -> vector<1x16x1xf32>
    %117 = vector.broadcast %116 : vector<1x16x1xf32> to vector<1x16x8xf32>
    %118 = arith.mulf %113, %117 : vector<1x16x8xf32>
    "tpu.trace_start"() <{level = 10 : i32, message = "bqk,bkd->bqd"}> : () -> ()
    %cst_78 = arith.constant dense<0.000000e+00> : vector<1x16x8xf32>
    %119 = tpu.matmul %118, %107, %cst_78 {dimension_numbers = #tpu.dot_dimension_numbers<[2], [1], [1], [2], [0, 0, 0, 1, 1, 2], [0], [0]>} : vector<1x16x8xf32>, vector<1x8x8xf32>, vector<1x16x8xf32> -> vector<1x16x8xf32>
    "tpu.trace_stop"() : () -> ()
    %120 = arith.addf %105, %119 : vector<1x16x8xf32>
    %c0_79 = arith.constant 0 : index
    %c0_80 = arith.constant 0 : index
    %c72 = arith.constant 72 : index
    %121 = vector.load %arg13[%c0_79, %c0_80, %c72] : memref<1x16x96xf32, #tpu.memory_space<vmem>>, vector<1x16x8xf32>
    %c0_81 = arith.constant 0 : index
    %c0_82 = arith.constant 0 : index
    %c8_83 = arith.constant 8 : index
    %122 = vector.load %arg14[%c0_81, %c0_82, %c8_83] : memref<1x8x64xf32, #tpu.memory_space<vmem>>, vector<1x8x8xf32>
    %c0_84 = arith.constant 0 : index
    %c0_85 = arith.constant 0 : index
    %c40_86 = arith.constant 40 : index
    %123 = vector.load %arg14[%c0_84, %c0_85, %c40_86] : memref<1x8x64xf32, #tpu.memory_space<vmem>>, vector<1x8x8xf32>
    "tpu.trace_start"() <{level = 10 : i32, message = "bqd,bkd->bqk"}> : () -> ()
    %cst_87 = arith.constant dense<0.000000e+00> : vector<1x16x8xf32>
    %124 = tpu.matmul %121, %122, %cst_87 {dimension_numbers = #tpu.dot_dimension_numbers<[2], [2], [1], [1], [0, 0, 0, 1, 1, 1], [0], [0]>} : vector<1x16x8xf32>, vector<1x8x8xf32>, vector<1x16x8xf32> -> vector<1x16x8xf32>
    "tpu.trace_stop"() : () -> ()
    %cst_88 = arith.constant dense<0xFF800000> : vector<1x16xf32>
    %125 = vector.multi_reduction <maximumf>, %124, %cst_88 [2] : vector<1x16x8xf32> to vector<1x16xf32>
    %126 = vector.shape_cast %125 : vector<1x16xf32> to vector<1x16x1xf32>
    %127 = vector.broadcast %126 : vector<1x16x1xf32> to vector<1x16x8xf32>
    %128 = arith.subf %124, %127 : vector<1x16x8xf32>
    %129 = math.exp %128 : vector<1x16x8xf32>
    %cst_89 = arith.constant dense<0.000000e+00> : vector<1x16xf32>
    %130 = vector.multi_reduction <add>, %129, %cst_89 [2] : vector<1x16x8xf32> to vector<1x16xf32>
    %131 = vector.shape_cast %130 : vector<1x16xf32> to vector<1x16x1xf32>
    %132 = tpu.reciprocal %131 {approx = true} : vector<1x16x1xf32> -> vector<1x16x1xf32>
    %133 = vector.broadcast %132 : vector<1x16x1xf32> to vector<1x16x8xf32>
    %134 = arith.mulf %129, %133 : vector<1x16x8xf32>
    "tpu.trace_start"() <{level = 10 : i32, message = "bqk,bkd->bqd"}> : () -> ()
    %cst_90 = arith.constant dense<0.000000e+00> : vector<1x16x8xf32>
    %135 = tpu.matmul %134, %123, %cst_90 {dimension_numbers = #tpu.dot_dimension_numbers<[2], [1], [1], [2], [0, 0, 0, 1, 1, 2], [0], [0]>} : vector<1x16x8xf32>, vector<1x8x8xf32>, vector<1x16x8xf32> -> vector<1x16x8xf32>
    "tpu.trace_stop"() : () -> ()
    %136 = arith.addf %121, %135 : vector<1x16x8xf32>
    %c0_91 = arith.constant 0 : index
    %c0_92 = arith.constant 0 : index
    %c80 = arith.constant 80 : index
    %137 = vector.load %arg13[%c0_91, %c0_92, %c80] : memref<1x16x96xf32, #tpu.memory_space<vmem>>, vector<1x16x8xf32>
    %c0_93 = arith.constant 0 : index
    %c0_94 = arith.constant 0 : index
    %c16_95 = arith.constant 16 : index
    %138 = vector.load %arg14[%c0_93, %c0_94, %c16_95] : memref<1x8x64xf32, #tpu.memory_space<vmem>>, vector<1x8x8xf32>
    %c0_96 = arith.constant 0 : index
    %c0_97 = arith.constant 0 : index
    %c48_98 = arith.constant 48 : index
    %139 = vector.load %arg14[%c0_96, %c0_97, %c48_98] : memref<1x8x64xf32, #tpu.memory_space<vmem>>, vector<1x8x8xf32>
    "tpu.trace_start"() <{level = 10 : i32, message = "bqd,bkd->bqk"}> : () -> ()
    %cst_99 = arith.constant dense<0.000000e+00> : vector<1x16x8xf32>
    %140 = tpu.matmul %137, %138, %cst_99 {dimension_numbers = #tpu.dot_dimension_numbers<[2], [2], [1], [1], [0, 0, 0, 1, 1, 1], [0], [0]>} : vector<1x16x8xf32>, vector<1x8x8xf32>, vector<1x16x8xf32> -> vector<1x16x8xf32>
    "tpu.trace_stop"() : () -> ()
    %cst_100 = arith.constant dense<0xFF800000> : vector<1x16xf32>
    %141 = vector.multi_reduction <maximumf>, %140, %cst_100 [2] : vector<1x16x8xf32> to vector<1x16xf32>
    %142 = vector.shape_cast %141 : vector<1x16xf32> to vector<1x16x1xf32>
    %143 = vector.broadcast %142 : vector<1x16x1xf32> to vector<1x16x8xf32>
    %144 = arith.subf %140, %143 : vector<1x16x8xf32>
    %145 = math.exp %144 : vector<1x16x8xf32>
    %cst_101 = arith.constant dense<0.000000e+00> : vector<1x16xf32>
    %146 = vector.multi_reduction <add>, %145, %cst_101 [2] : vector<1x16x8xf32> to vector<1x16xf32>
    %147 = vector.shape_cast %146 : vector<1x16xf32> to vector<1x16x1xf32>
    %148 = tpu.reciprocal %147 {approx = true} : vector<1x16x1xf32> -> vector<1x16x1xf32>
    %149 = vector.broadcast %148 : vector<1x16x1xf32> to vector<1x16x8xf32>
    %150 = arith.mulf %145, %149 : vector<1x16x8xf32>
    "tpu.trace_start"() <{level = 10 : i32, message = "bqk,bkd->bqd"}> : () -> ()
    %cst_102 = arith.constant dense<0.000000e+00> : vector<1x16x8xf32>
    %151 = tpu.matmul %150, %139, %cst_102 {dimension_numbers = #tpu.dot_dimension_numbers<[2], [1], [1], [2], [0, 0, 0, 1, 1, 2], [0], [0]>} : vector<1x16x8xf32>, vector<1x8x8xf32>, vector<1x16x8xf32> -> vector<1x16x8xf32>
    "tpu.trace_stop"() : () -> ()
    %152 = arith.addf %137, %151 : vector<1x16x8xf32>
    %c0_103 = arith.constant 0 : index
    %c0_104 = arith.constant 0 : index
    %c88 = arith.constant 88 : index
    %153 = vector.load %arg13[%c0_103, %c0_104, %c88] : memref<1x16x96xf32, #tpu.memory_space<vmem>>, vector<1x16x8xf32>
    %c0_105 = arith.constant 0 : index
    %c0_106 = arith.constant 0 : index
    %c24_107 = arith.constant 24 : index
    %154 = vector.load %arg14[%c0_105, %c0_106, %c24_107] : memref<1x8x64xf32, #tpu.memory_space<vmem>>, vector<1x8x8xf32>
    %c0_108 = arith.constant 0 : index
    %c0_109 = arith.constant 0 : index
    %c56_110 = arith.constant 56 : index
    %155 = vector.load %arg14[%c0_108, %c0_109, %c56_110] : memref<1x8x64xf32, #tpu.memory_space<vmem>>, vector<1x8x8xf32>
    "tpu.trace_start"() <{level = 10 : i32, message = "bqd,bkd->bqk"}> : () -> ()
    %cst_111 = arith.constant dense<0.000000e+00> : vector<1x16x8xf32>
    %156 = tpu.matmul %153, %154, %cst_111 {dimension_numbers = #tpu.dot_dimension_numbers<[2], [2], [1], [1], [0, 0, 0, 1, 1, 1], [0], [0]>} : vector<1x16x8xf32>, vector<1x8x8xf32>, vector<1x16x8xf32> -> vector<1x16x8xf32>
    "tpu.trace_stop"() : () -> ()
    %cst_112 = arith.constant dense<0xFF800000> : vector<1x16xf32>
    %157 = vector.multi_reduction <maximumf>, %156, %cst_112 [2] : vector<1x16x8xf32> to vector<1x16xf32>
    %158 = vector.shape_cast %157 : vector<1x16xf32> to vector<1x16x1xf32>
    %159 = vector.broadcast %158 : vector<1x16x1xf32> to vector<1x16x8xf32>
    %160 = arith.subf %156, %159 : vector<1x16x8xf32>
    %161 = math.exp %160 : vector<1x16x8xf32>
    %cst_113 = arith.constant dense<0.000000e+00> : vector<1x16xf32>
    %162 = vector.multi_reduction <add>, %161, %cst_113 [2] : vector<1x16x8xf32> to vector<1x16xf32>
    %163 = vector.shape_cast %162 : vector<1x16xf32> to vector<1x16x1xf32>
    %164 = tpu.reciprocal %163 {approx = true} : vector<1x16x1xf32> -> vector<1x16x1xf32>
    %165 = vector.broadcast %164 : vector<1x16x1xf32> to vector<1x16x8xf32>
    %166 = arith.mulf %161, %165 : vector<1x16x8xf32>
    "tpu.trace_start"() <{level = 10 : i32, message = "bqk,bkd->bqd"}> : () -> ()
    %cst_114 = arith.constant dense<0.000000e+00> : vector<1x16x8xf32>
    %167 = tpu.matmul %166, %155, %cst_114 {dimension_numbers = #tpu.dot_dimension_numbers<[2], [1], [1], [2], [0, 0, 0, 1, 1, 2], [0], [0]>} : vector<1x16x8xf32>, vector<1x8x8xf32>, vector<1x16x8xf32> -> vector<1x16x8xf32>
    "tpu.trace_stop"() : () -> ()
    %168 = arith.addf %153, %167 : vector<1x16x8xf32>
    %169 = tpu.concatenate %120, %136, %152, %168 in 2 : vector<1x16x8xf32>, vector<1x16x8xf32>, vector<1x16x8xf32>, vector<1x16x8xf32> -> vector<1x16x32xf32>
    %170 = vector.shape_cast %169 : vector<1x16x32xf32> to vector<16x32xf32>
    %c1 = arith.constant 1 : index
    %c0_115 = arith.constant 0 : index
    %c0_116 = arith.constant 0 : index
    %171 = vector.load %arg10[%c1, %c0_115, %c0_116] : memref<2x32x32xf32, #tpu.memory_space<vmem>>, vector<1x32x32xf32>
    %172 = vector.shape_cast %171 : vector<1x32x32xf32> to vector<32x32xf32>
    %cst_117 = arith.constant dense<0.000000e+00> : vector<16x32xf32>
    %173 = tpu.matmul %170, %172, %cst_117 {dimension_numbers = #tpu.dot_dimension_numbers<[1], [0], [0], [1], [0, 0, 1, 1], [], []>} : vector<16x32xf32>, vector<32x32xf32>, vector<16x32xf32> -> vector<16x32xf32>
    %c1_118 = arith.constant 1 : index
    %c0_119 = arith.constant 0 : index
    %c0_120 = arith.constant 0 : index
    %174 = vector.load %arg11[%c1_118, %c0_119, %c0_120] : memref<2x1x32xf32, #tpu.memory_space<vmem>>, vector<1x1x32xf32>
    %175 = vector.shape_cast %174 : vector<1x1x32xf32> to vector<1x32xf32>
    %176 = vector.broadcast %175 : vector<1x32xf32> to vector<16x32xf32>
    %177 = arith.addf %173, %176 : vector<16x32xf32>
    %cst_121 = arith.constant 0.000000e+00 : f32
    %178 = vector.broadcast %cst_121 : f32 to vector<16x32xf32>
    %179 = arith.maximumf %177, %178 : vector<16x32xf32>
    %180 = arith.addf %170, %179 : vector<16x32xf32>
    %c0_122 = arith.constant 0 : index
    %c0_123 = arith.constant 0 : index
    %181 = vector.load %arg12[%c0_122, %c0_123] : memref<16x32xf32, #tpu.memory_space<vmem>>, vector<16x32xf32>
    tpu.vector_store %arg12[%c0_122, %c0_123], %180 {strides = array<i32>} : memref<16x32xf32, #tpu.memory_space<vmem>>, vector<16x32xf32>,
    return
  }
  func.func @transform_0(%arg0: i32) -> (i32, i32) {
    %c0_i32 = arith.constant 0 : i32
    %c0_i32_0 = arith.constant 0 : i32
    %c0_i32_1 = arith.constant 0 : i32
    return %c0_i32, %c0_i32_0 : i32, i32
  }
  func.func @transform_1(%arg0: i32) -> (i32, i32) {
    %c0_i32 = arith.constant 0 : i32
    %c0_i32_0 = arith.constant 0 : i32
    return %arg0, %c0_i32 : i32, i32
  }
  func.func @transform_2(%arg0: i32) -> (i32, i32, i32) {
    %c0_i32 = arith.constant 0 : i32
    %c0_i32_0 = arith.constant 0 : i32
    %c0_i32_1 = arith.constant 0 : i32
    return %arg0, %c0_i32, %c0_i32_0 : i32, i32, i32
  }
  func.func @transform_3(%arg0: i32) -> (i32, i32) {
    %c0_i32 = arith.constant 0 : i32
    %c0_i32_0 = arith.constant 0 : i32
    %c0_i32_1 = arith.constant 0 : i32
    return %c0_i32, %c0_i32_0 : i32, i32
  }
  func.func @transform_4(%arg0: i32) -> (i32, i32) {
    %c0_i32 = arith.constant 0 : i32
    %c0_i32_0 = arith.constant 0 : i32
    %c0_i32_1 = arith.constant 0 : i32
    return %c0_i32, %c0_i32_0 : i32, i32
  }
  func.func @transform_5(%arg0: i32) -> (i32, i32) {
    %c0_i32 = arith.constant 0 : i32
    %c0_i32_0 = arith.constant 0 : i32
    %c0_i32_1 = arith.constant 0 : i32
    return %c0_i32, %c0_i32_0 : i32, i32
  }
  func.func @transform_6(%arg0: i32) -> (i32, i32) {
    %c0_i32 = arith.constant 0 : i32
    %c0_i32_0 = arith.constant 0 : i32
    %c0_i32_1 = arith.constant 0 : i32
    return %c0_i32, %c0_i32_0 : i32, i32
  }
  func.func @transform_7(%arg0: i32) -> (i32, i32) {
    %c0_i32 = arith.constant 0 : i32
    %c0_i32_0 = arith.constant 0 : i32
    %c0_i32_1 = arith.constant 0 : i32
    return %c0_i32, %c0_i32_0 : i32, i32
  }
  func.func @transform_8(%arg0: i32) -> (i32, i32) {
    %c0_i32 = arith.constant 0 : i32
    %c0_i32_0 = arith.constant 0 : i32
    %c0_i32_1 = arith.constant 0 : i32
    return %c0_i32, %c0_i32_0 : i32, i32
  }
  func.func @transform_9(%arg0: i32) -> (i32, i32, i32) {
    %c0_i32 = arith.constant 0 : i32
    %c0_i32_0 = arith.constant 0 : i32
    %c0_i32_1 = arith.constant 0 : i32
    %c0_i32_2 = arith.constant 0 : i32
    return %c0_i32, %c0_i32_0, %c0_i32_1 : i32, i32, i32
  }
  func.func @transform_10(%arg0: i32) -> (i32, i32, i32) {
    %c0_i32 = arith.constant 0 : i32
    %c0_i32_0 = arith.constant 0 : i32
    %c0_i32_1 = arith.constant 0 : i32
    %c0_i32_2 = arith.constant 0 : i32
    return %c0_i32, %c0_i32_0, %c0_i32_1 : i32, i32, i32
  }
  func.func @transform_11(%arg0: i32) -> (i32, i32) {
    %c0_i32 = arith.constant 0 : i32
    %c0_i32_0 = arith.constant 0 : i32
    return %arg0, %c0_i32 : i32, i32
  }
}

</mosaic_0001>

<bundles_post_ra>
// kernel: tpu_custom_call.1
= control target key start
LH: loop header
LB: loop body
LE: loop exit
PB: predicated region body
PF: predicated region fallthrough
CT: control target
= control target key end

     0   :  { %s4100_s0 = inlined_call_operand.vmem [shape: f32[8,32], index: 0, kind: input, shape index: {}]   ;;  %s4101_s1 = inlined_call_operand.vmem [shape: f32[32,8], index: 1, kind: input, shape index: {}]   ;;  %s4102_s2 = inlined_call_operand.vmem [shape: f32[2,1,16], index: 2, kind: input, shape index: {}]   ;;  %s4103_s3 = inlined_call_operand.hbm [shape: f32[32,32], index: 3, kind: input, shape index: {}]   ;;  %s4104_s4 = inlined_call_operand.hbm [shape: f32[1,32], index: 4, kind: input, shape index: {}]   ;;  %s4105_s5 = inlined_call_operand.hbm [shape: f32[8,96], index: 5, kind: input, shape index: {}]   ;;  %s4106_s6 = inlined_call_operand.hbm [shape: f32[1,96], index: 6, kind: input, shape index: {}]   ;;  %s4107_s7 = inlined_call_operand.hbm [shape: f32[32,64], index: 7, kind: input, shape index: {}]   ;;  %s4108_s8 = inlined_call_operand.hbm [shape: f32[1,64], index: 8, kind: input, shape index: {}]   ;;  %s4109_s9 = inlined_call_operand.vmem [shape: f32[2,32,32], index: 9, kind: input, shape index: {}]   ;;  %s4110_s10 = inlined_call_operand.vmem [shape: f32[2,1,32], index: 10, kind: input, shape index: {}]   ;;  %s4111_s11 = inlined_call_operand.hbm [shape: f32[32,32], index: 11, kind: output, shape index: {}]  }
   0x1   :  { %4122 = sst [smem:[#allocation27_spill]] %s4104_s4 }
   0x2   :  { %4123 = sst [smem:[#allocation28_spill]] %s4106_s6 }
   0x3   :  { %4124 = sst [smem:[#allocation29_spill]] %s4111_s11 }
   0x4   :  { %16 = vsyncpa [#allocation5], 0 }
   0x5   :  { %17 = vsyncpa [#allocation8], 0 }
   0x6   :  { %18 = vsyncpa [#allocation11], 0 }
   0x7   :  { %19 = vsyncpa [#allocation14], 0 }
   0x8   :  { %20 = vsyncpa [#allocation6], 0 }
   0x9   :  { %22 = vsyncpa [#allocation6 + $0x1], 0  ;;  %s3567_s17 = smov 0   ;;  %s3569_s18 = smov 0  }
   0xa   :  { %s3571_s19 = smov 0   ;;  %s3573_s20 = smov 0  }
   0xb LB: > { %4125 = sst [smem:[#allocation21_spill]] %s3466_s17  ;;  %s3588_s21 = sadd.s32 4294967295, %s3478_s20   ;;  %s3478_s20 = sphi %s3573_s20, %s4155_s20   ;;  %s3474_s19 = sphi %s3571_s19, %s4157_s19   ;;  %s3470_s18 = sphi %s3569_s18, %s4159_s18   ;;  %s3466_s17 = sphi %s3567_s17, %s4158_s17  }
   0xc   : > { %4126 = sst [smem:[#allocation22_spill]] %s3474_s19  ;;  %s2679_s22 = sadd.s32 4294967294, %s3478_s20  }
   0xd   : > { %4127 = sst [smem:[#allocation23_spill]] %s3478_s20  ;;  %s3592_s23 = sadd.s32 1, %s3478_s20  }
   0xe   : > { %4128 = sst [smem:[#allocation24_spill]] %s3592_s23  ;;  %s276_s24 = sadd.s32 1, %s3474_s19 }
   0xf   : > { %s273_s25 = ssub.s32 %s3478_s20, %s3592_s23  ;;  %p286_p0 = scmp.ne.s32.totalorder %s3474_s19, %s3470_s18 }
  0x10   : > { %p274_p1 = scmp.eq.s32.totalorder %s273_s25, 0  ;;  %p287_p2 = scmp.eq.s32.totalorder %s3588_s21, 1 }
  0x11   : > { %p292_p3 = scmp.ne.s32.totalorder %s3470_s18, %s3466_s17  ;;  %p293_p4 = scmp.eq.s32.totalorder %s2679_s22, 1 }
  0x12   : > { %s3603_s26 = scalar_select %p274_p1, %s3474_s19, %s276_s24  }
  0x13   : > { %p3605_p5 = por %p287_p2, %p286_p0  ;;  %p3609_p6 = por %p293_p4, %p292_p3 }
  0x14   : > { %4129 = sst [smem:[#allocation25_spill]] %s3603_s26  ;;  %p2680_p7 = scmp.ge.s32.totalorder %s3478_s20, 1 }
  0x15   : > { %s4130_s27 = scalar_select %p3605_p5, 1, 0 }
  0x16   : > { %s4131_s28 = scalar_select %p3609_p6, 1, 0 }
  0x17   : > { %p300_p8 = scmp.lt.s32.totalorder %s3478_s20, 3  ;;  %p4115_p9 = scmp.eq.s32.totalorder %s3588_s21, 0 }
  0x18   : > { %4132 = sst [smem:[#allocation26_spill]] %s4131_s28  ;;  %s3480_s30 = smov [#allocation7]  }
  0x19   : > { %p3616_p10 = pnand %p2680_p7, %p300_p8  ;;  %s329_s12 = sshll.u32 %s3480_s30, 4  ;;  %s330_s12 = int_to_ptr.vmem [resolvable:$true] %s329_s12 }
  0x1a   : > { %s3481_s13 = smov [#allocation10]   ;;  %s3482_s16 = smov [#allocation4]  }
  0x1b   : > { %s4133_s29 = scalar_select %p3616_p10, 1, 0 }
  0x1c   : > { %p3055_p11 = pneg %p3616_p10  ;;  %s351_s14 = sshll.u32 %s3481_s13, 4  ;;  %s3628_s14 = int_to_ptr.vmem [resolvable:$true] %s351_s14 }
  0x1d   : > { %s315_s22 = sshll.u32 %s3482_s16, 4  ;;  %s4135_s4 = sld [smem:[#allocation27_spill]]  ;;  %s3630_s22 = int_to_ptr.vmem [resolvable:$true] %s315_s22 }
  0x1e   : > { %p3624_p12 = pnand %p4115_p9, %p3055_p11 }
  0x20   : > { %p3640_p0 = pneg %p3624_p12 }
  0x23   : > { %s3232_s30 = scalar_lea.hbm %s4135_s4, 16 }
  0x24   : > { %p3233_p13 = scmp.ne.s32.totalorder %s4135_s4, %s3232_s30  ;;  %p3239_p3 = scmp.lt.u32.totalorder %s3232_s30, %s4135_s4 }
  0x26   : > { %p3235_p1 = pnand %p3640_p0, %p3233_p13 }
  0x28   : > { %p3236_p2 = pneg %p3235_p1 }
  0x2a   : > { %p3241_p4 = pnand %p3239_p3, %p3236_p2 }
  0x2c   : > { %3244 = shalt.err (!%p3241_p4)
}
  0x2d   : > { %s3245_s24 = scalar_lea.vmem %s330_s12, 16  ;;  %s3252_s19 = scalar_lea.vmem %s330_s12, 32 }
  0x2e   : > { %p3246_p7 = scmp.ne.s32.totalorder %s330_s12, %s3245_s24  ;;  %p3253_p9 = scmp.lt.s32.totalorder %s330_s12, %s330_s12 }
  0x2f   : > { %p3254_p6 = scmp.lt.s32.totalorder %s3252_s19, %s3245_s24 }
  0x30   : > { %p3248_p8 = pnand %p3246_p7, %p3640_p0 }
  0x31   : > { %p3255_p5 = por %p3254_p6, %p3253_p9 }
  0x32   : > { %p3249_p11 = pneg %p3248_p8 }
  0x34   : > { %p3256_p10 = pnand %p3255_p5, %p3249_p11 }
  0x36   : > { %3259 = shalt.err (!%p3256_p10)
}
  0x37   : > { %3061 = dma.hbm_to_vmem [thread:$0]  (!%p3624_p12), %s4135_s4, 16, %s330_s12, [#allocation8]  }
  0x38   : > { %s4137_s6 = sld [smem:[#allocation28_spill]] }
  0x3e   : > { %s3260_s16 = scalar_lea.hbm %s4137_s6, 16 }
  0x3f   : > { %p3261_p13 = scmp.ne.s32.totalorder %s4137_s6, %s3260_s16  ;;  %p3267_p5 = scmp.lt.u32.totalorder %s3260_s16, %s4137_s6 }
  0x41   : > { %p3263_p1 = pnand %p3261_p13, %p3640_p0 }
  0x43   : > { %p3264_p6 = pneg %p3263_p1 }
  0x45   : > { %p3269_p9 = pnand %p3267_p5, %p3264_p6 }
  0x47   : > { %3272 = shalt.err (!%p3269_p9)
}
  0x48   : > { %s3273_s12 = scalar_lea.vmem %s3628_s14, 16  ;;  %s3280_s17 = scalar_lea.vmem %s3628_s14, 32 }
  0x49   : > { %p3274_p10 = scmp.ne.s32.totalorder %s3628_s14, %s3273_s12  ;;  %p3281_p4 = scmp.lt.s32.totalorder %s3628_s14, %s3628_s14 }
  0x4a   : > { %p3282_p7 = scmp.lt.s32.totalorder %s3280_s17, %s3273_s12 }
  0x4b   : > { %p3276_p2 = pnand %p3274_p10, %p3640_p0 }
  0x4c   : > { %p3283_p8 = por %p3282_p7, %p3281_p4 }
  0x4d   : > { %p3277_p3 = pneg %p3276_p2 }
  0x4f   : > { %p3284_p11 = pnand %p3283_p8, %p3277_p3 }
  0x51   : > { %3287 = shalt.err (!%p3284_p11)
}
  0x52   : > { %3067 = dma.hbm_to_vmem [thread:$0]  (!%p3624_p12), %s4137_s6, 16, %s3628_s14, [#allocation11]  }
  0x53   : > { %s3288_s30 = scalar_lea.hbm %s4103_s3, 512 }
  0x54   : > { %p3289_p13 = scmp.ne.s32.totalorder %s4103_s3, %s3288_s30  ;;  %p3295_p5 = scmp.lt.u32.totalorder %s3288_s30, %s4103_s3 }
  0x56   : > { %p3291_p1 = pnand %p3289_p13, %p3640_p0 }
  0x58   : > { %p3292_p6 = pneg %p3291_p1 }
  0x5a   : > { %p3297_p9 = pnand %p3295_p5, %p3292_p6 }
  0x5c   : > { %3300 = shalt.err (!%p3297_p9)
}
  0x5d   : > { %s3301_s14 = scalar_lea.vmem %s3630_s22, 512  ;;  %p3309_p4 = scmp.lt.s32.totalorder %s3630_s22, %s3630_s22 }
  0x5e   : > { %p3302_p10 = scmp.ne.s32.totalorder %s3630_s22, %s3301_s14  ;;  %p3310_p7 = scmp.lt.s32.totalorder %s3301_s14, %s3301_s14 }
  0x60   : > { %p3304_p2 = pnand %p3302_p10, %p3640_p0  ;;  %p3311_p8 = por %p3310_p7, %p3309_p4 }
  0x62   : > { %p3305_p3 = pneg %p3304_p2 }
  0x64   : > { %p3312_p11 = pnand %p3311_p8, %p3305_p3 }
  0x66   : > { %3315 = shalt.err (!%p3312_p11)
}
  0x67   : > { %s3483_s17 = smov 128   ;;  %s3484_s28 = smov 8  }
  0x68   : > { %3058 = dma.hbm_to_vmem [thread:$0]  (!%p3624_p12), %s4103_s3, 512, %s3630_s22, [#allocation5], %s3483_s17, %s3483_s17, %s3484_s28  }
  0x69   : > { %s3485_s23 = smov [#allocation9]   ;;  %s3486_s16 = smov [#allocation12]  }
  0x6a   : > { %s340_s30 = sshll.u32 %s3485_s23, 4  ;;  %s361_s24 = sshll.u32 %s3486_s16, 4  ;;  %s341_s30 = int_to_ptr.vmem [resolvable:$true] %s340_s30  ;;  %s362_s24 = int_to_ptr.vmem [resolvable:$true] %s361_s24 }
  0x6b   : > { %s3316_s14 = scalar_lea.hbm %s4105_s5, 128 }
  0x6c   : > { %p3317_p13 = scmp.ne.s32.totalorder %s4105_s5, %s3316_s14  ;;  %p3323_p5 = scmp.lt.u32.totalorder %s3316_s14, %s4105_s5 }
  0x6e   : > { %p3319_p1 = pnand %p3317_p13, %p3640_p0 }
  0x70   : > { %p3320_p6 = pneg %p3319_p1 }
  0x72   : > { %p3325_p9 = pnand %p3323_p5, %p3320_p6 }
  0x74   : > { %3328 = shalt.err (!%p3325_p9)
}
  0x75   : > { %s3329_s22 = scalar_lea.vmem %s341_s30, 128  ;;  %p3337_p4 = scmp.lt.s32.totalorder %s341_s30, %s341_s30 }
  0x76   : > { %p3330_p10 = scmp.ne.s32.totalorder %s341_s30, %s3329_s22  ;;  %p3338_p7 = scmp.lt.s32.totalorder %s3329_s22, %s3329_s22 }
  0x78   : > { %p3332_p2 = pnand %p3330_p10, %p3640_p0  ;;  %p3339_p8 = por %p3338_p7, %p3337_p4 }
  0x7a   : > { %p3333_p3 = pneg %p3332_p2 }
  0x7c   : > { %p3340_p11 = pnand %p3339_p8, %p3333_p3 }
  0x7e   : > { %3343 = shalt.err (!%p3340_p11)
}
  0x7f   : > { %3064 = dma.hbm_to_vmem [thread:$0]  (!%p3624_p12), %s4105_s5, 128, %s341_s30, [#allocation8]  }
  0x80   : > { %s3344_s26 = scalar_lea.hbm %s4107_s7, 512 }
  0x81   : > { %p3345_p13 = scmp.ne.s32.totalorder %s4107_s7, %s3344_s26  ;;  %p3351_p5 = scmp.lt.u32.totalorder %s3344_s26, %s4107_s7 }
  0x83   : > { %p3347_p1 = pnand %p3345_p13, %p3640_p0 }
  0x85   : > { %p3348_p6 = pneg %p3347_p1 }
  0x87   : > { %p3353_p9 = pnand %p3351_p5, %p3348_p6 }
  0x89   : > { %3356 = shalt.err (!%p3353_p9)
}
  0x8a   : > { %s3357_s12 = scalar_lea.vmem %s362_s24, 512  ;;  %p3365_p4 = scmp.lt.s32.totalorder %s362_s24, %s362_s24 }
  0x8b   : > { %p3358_p10 = scmp.ne.s32.totalorder %s362_s24, %s3357_s12  ;;  %p3366_p7 = scmp.lt.s32.totalorder %s3357_s12, %s3357_s12 }
  0x8d   : > { %p3360_p2 = pnand %p3358_p10, %p3640_p0  ;;  %p3367_p8 = por %p3366_p7, %p3365_p4 }
  0x8f   : > { %p3361_p3 = pneg %p3360_p2 }
  0x91   : > { %p3368_p11 = pnand %p3367_p8, %p3361_p3 }
  0x93   : > { %3371 = shalt.err (!%p3368_p11)
}
  0x94   : > { %3070 = dma.hbm_to_vmem [thread:$0]  (!%p3624_p12), %s4107_s7, 512, %s362_s24, [#allocation11], %s3483_s17, %s3483_s17, %s3484_s28  }
  0x95   : > { %s3487_s22 = smov [#allocation13]   ;;  %s3372_s20 = scalar_lea.hbm %s4108_s8, 16 }
  0x96   : > { %s375_s4 = sshll.u32 %s3487_s22, 4  ;;  %p3373_p13 = scmp.ne.s32.totalorder %s4108_s8, %s3372_s20  ;;  %s376_s4 = int_to_ptr.vmem [resolvable:$true] %s375_s4 }
  0x97   : > { %p3379_p5 = scmp.lt.u32.totalorder %s3372_s20, %s4108_s8 }
  0x98   : > { %p3375_p1 = pnand %p3373_p13, %p3640_p0 }
  0x9a   : > { %p3376_p6 = pneg %p3375_p1 }
  0x9c   : > { %p3381_p9 = pnand %p3379_p5, %p3376_p6 }
  0x9e   : > { %3384 = shalt.err (!%p3381_p9)
}
  0x9f   : > { %s3385_s17 = scalar_lea.vmem %s376_s4, 16  ;;  %s3392_s28 = scalar_lea.vmem %s376_s4, 32 }
  0xa0   : > { %p3386_p10 = scmp.ne.s32.totalorder %s376_s4, %s3385_s17  ;;  %p3393_p4 = scmp.lt.s32.totalorder %s376_s4, %s376_s4 }
  0xa1   : > { %p3394_p7 = scmp.lt.s32.totalorder %s3392_s28, %s3385_s17 }
  0xa2   : > { %p3388_p2 = pnand %p3386_p10, %p3640_p0 }
  0xa3   : > { %p3395_p8 = por %p3394_p7, %p3393_p4 }
  0xa4   : > { %p3389_p3 = pneg %p3388_p2 }
  0xa6   : > { %p3396_p11 = pnand %p3395_p8, %p3389_p3 }
  0xa8   : > { %3399 = shalt.err (!%p3396_p11)
}
  0xa9   : > { %3073 = dma.hbm_to_vmem [thread:$0]  (!%p3624_p12), %s4108_s8, 16, %s376_s4, [#allocation14]  }
  0xaa   : > { %p4138_p13 = scmp.ne.s32.totalorder %s4133_s29, 0 }
  0xab   : > { %p4139_p1 = scmp.eq.s32.totalorder (!%p4138_p13), %s3588_s21, 0 }
  0xac   : > { %409 = sbr.rel (%p4138_p13) target bundleno = 4674 (0x1242), region = 64 }
  0xb3   : > { %3445 = dma.done.wait (%p4139_p1), [#allocation5], 512   ;;  %p4140_p0 = pmov %p4139_p1 }
  0xb5   : > { %3447 = vsyncadd (%p4140_p0), [#allocation5], 4294966784  ;;  %p4141_p6 = pmov %p4140_p0 }
  0xb6   : > { %p4142_p5 = pmov %p4140_p0 }
  0xb7   : > { %3449 = dma.done.wait (%p4141_p6), [#allocation8], 144  }
  0xb8   : > { %3451 = vsyncadd (%p4142_p5), [#allocation8], 4294967152  ;;  %p4143_p9 = pmov %p4140_p0 }
  0xb9   : > { %p4144_p12 = pmov %p4140_p0 }
  0xba   : > { %3453 = dma.done.wait (%p4143_p9), [#allocation11], 528  }
  0xbb   : > { %3455 = vsyncadd (%p4144_p12), [#allocation11], 4294966768  ;;  %p4145_p10 = pmov %p4140_p0 }
  0xbc   : > { %p4146_p2 = pmov %p4140_p0 }
  0xbd   : > { %3457 = dma.done.wait (%p4145_p10), [#allocation14], 16  }
  0xbe   : > { %3459 = vsyncadd (%p4146_p2), [#allocation14], 4294967280  ;;  %s2696_s29 = sshll.u32 %s3588_s21, 1  ;;  %v3488_v0 = vmov 0.0|0.0   ;;  %vm3489_vm0 = vmmov 0   ;;  %v3490_v1 = vmov 0.0  }
  0xbf   : > { %p473_p3 = scmp.lt.s32.totalorder %s2696_s29, 3  ;;  %2975 = vmatprep.subr.bf16.mxu0 %v3488_v0  ;;  %2838 = vmatprep.mubr.msk.f32.mxu0 %vm3489_vm0, %v3490_v1  ;;  %vm578_vm1 = vcmask 64512   ;;  %v570_v2 = vld [vmem:[#allocation9] sm:$0xff]  ;;  %v487_v7 = vld [vmem:[#allocation4 + $0x10] sm:$0xff]  ;;  %v488_v9 = vld [vmem:[#allocation4 + $0x18] sm:$0xff]  ;;  %vm496_vm2 = vcmask 261120  }
  0xc0   : > { %2841 = vmatprep.subr.mxu1 %v570_v2  ;;  %v485_v5 = vld [vmem:[#allocation4] sm:$0xff]  ;;  %v486_v6 = vld [vmem:[#allocation4 + $0x8] sm:$0xff]  ;;  %v2979_v10 = vpack.c.bf16 %v488_v9, %v487_v7  ;;  %vm660_vm3 = vcmask 785408   ;;  %vm3807_vm4 = vmpackc.low %vm578_vm1, %vm578_vm1  ;;  %s3491_s4 = smov 96   ;;  %s3492_s6 = smov 120   ;;  %vm751_vm5 = vcmask 130048  }
  0xc1   : > { %s4161_s29 = smov (!%p473_p3, %s2696_s29), 3  ;;  %2842 = vmatpush3.msra.mxu1 %v570_v2  ;;  %v2976_v8 = vpack.c.bf16 %v486_v6, %v485_v5  ;;  %v484_v11 = vld [vmem:[%s4100_s0] sm:$0xff]  ;;  %v2698_v24 = vld [vmem:[#allocation7] ss:$0 sm:$0xff]  ;;  %p478_p4 = scmp.lt.s32.totalorder %s3588_s21, 1  ;;  %vm1388_vm6 = vcmask 195584  }
  0xc2   : > { %s2697_s15 = sshll.u32 %s4161_s29, 3  ;;  %2981 = vmatprep.subr.bf16.mxu1 %v3488_v0  ;;  %v2700_v12 = vld [vmem:[#allocation10] ss:$0 sm:$0xff]  ;;  %s3493_s23 = smov 88   ;;  %vm1560_vm7 = vcmask 523264  }
  0xc3   : > { %s476_s30 = scalar_lea.vmem %s4101_s1, %s2697_s15  ;;  %2977 = vmatpush3.bf16.msra.mxu0 %v2976_v8  ;;  %s3494_s16 = smov 112  }
  0xc4   : > { %v482_v3 = vld [vmem:[%s476_s30] sm:$0xff]  ;;  %v483_v4 = vld [vmem:[%s476_s30 + $0x8] sm:$0xff]  ;;  %2978 = vmatprep.subr.bf16.mxu0 %v3488_v0  ;;  %s479_s11 = scalar_select %p478_p4, %s3588_s21, 1 }
  0xc5   : > { %2843 = vmatprep.mubr.msk.f32.mxu1 %vm578_vm1, %v482_v3  ;;  %s3495_s17 = smov 80   ;;  %s3496_s28 = smov 104  }
  0xc6   : > { %2844 = vmatmul.mubr.msk.f32.vlgmr.msra.gmra.mrb[0].mxu1 %vm578_vm1, %v483_v4  ;;  %s480_s25 = scalar_lea.vmem %s4102_s2, %s479_s11  ;;  %s3497_s24 = smov 72  }
  0xc7   : > { %2850 = vmatprep.mubr.msk.f32.mxu1 %vm3489_vm0, %v3490_v1  ;;  %2980 = vmatpush3.bf16.msra.mxu0 %v2979_v10  ;;  %v3836_v30 = vld [vmem:[%s480_s25] ss:$0 sm:$0xff]  ;;  %s3498_s19 = smov 16   ;;  %s3499_s29 = smov 8  }
  0xc8   : > { %2992 = vmatprep.subr.bf16.mxu0 %v3488_v0  ;;  %s3500_s15 = smov 56   ;;  %s3501_s25 = smov 24  }
  0xc9   : > { %s3503_s12 = smov 48   ;;  %s469_s22 = sand.u32 1, %s3470_s18  }
  0xca   : > { %2839 = vmatmul.mubr.msk.f32.vlgmr.msra.gmra.mrb[0].mxu0 %vm496_vm2, %v484_v11  ;;  %s2695_s11 = sshll.u32 %s469_s22, 4  ;;  %p4150_p8 = scmp.ne.s32.totalorder %s4130_s27, 0 }
  0xcb   : > { %2871 = vmatprep.mubr.msk.f32.mxu0 %vm3489_vm0, %v3490_v1 }
 0x199   : > { %v2845_v13 = vpop.f32.mrb[0].mxu1 }
 0x19a   : > { %v657_v14 = vadd.f32 %v2845_v13, %v2700_v12  ;;  %v651_v15 = vpop.f32.mrb[1].mxu1 }
 0x19b   : > { %v652_v16 = vadd.f32 %v2700_v12, %v651_v15 }
 0x19c   : > { %662 = vst.msk [vmem:[#allocation2 + $0x8] sm:$0xff] %vm660_vm3, %v657_v14 }
 0x19d   : > { %661 = vst.msk [vmem:[#allocation2] sm:$0xff] %vm660_vm3, %v652_v16  ;;  %v566_v17 = vpop.f32.mrb[0].mxu0 }
 0x19e   : > { %v2840_v18 = vpop.f32.mrb[1].mxu0  ;;  %v3822_v25 = vadd.f32 %v2698_v24, %v566_v17 }
 0x1a3   : > { %v3801_v19 = vld [vmem:[#allocation2 + $0x8] sm:$0xff] }
 0x1a4   : > { %v3803_v20 = vld [vmem:[#allocation2] sm:$0xff] }
 0x1a5   : > { %v3813_v22 = vpack.i.bf16 %v3801_v19, %v3803_v20  ;;  %v2982_v23 = vpack.c.bf16 %v3801_v19, %v3803_v20 }
 0x1a7   : > { %3150 = vrot.lane.b32.xlu1 %v3813_v22, %s3491_s4  ;;  %2984 = vmatpush3.bf16.xpose.msk.msra.mxu1 %vm3807_vm4, %v2982_v23 }
 0x1a8   : > { %2985 = vmatprep.subr.bf16.mxu1 %v3488_v0 }
 0x1ab   : > { %3155 = vrot.lane.b32.xlu1 %v3813_v22, %s3492_s6 }
 0x1ae   : > { %2851 = vmatmul.mubr.msk.f32.vlgmr.msra.gmra.mrb[2].mxu1 %vm578_vm1, %v3822_v25 }
 0x1af   : > { %2857 = vmatprep.mubr.msk.f32.mxu1 %vm3489_vm0, %v3490_v1 }
 0x219   : > { %v3151_v26 = vpop.permute.xlu1 %3150 }
 0x21a   : > { %v3153_v27 = vunpack.i.h.bf16 %v3151_v26  ;;  %v3152_v28 = vunpack.i.l.bf16 %v3151_v26 }
 0x21c   : > { %v2986_v29 = vpack.c.bf16 %v3153_v27, %v3152_v28 }
 0x21d   : > { %v3156_v41 = vpop.permute.xlu1 %3155 }
 0x21e   : > { %2987 = vmatpush3.bf16.msra.mxu1 %v2986_v29  ;;  %v3158_v42 = vunpack.i.h.bf16 %v3156_v41  ;;  %v3157_v43 = vunpack.i.l.bf16 %v3156_v41 }
 0x21f   : > { %2988 = vmatprep.subr.bf16.mxu1 %v3488_v0 }
 0x220   : > { %v2989_v46 = vpack.c.bf16 %v3158_v42, %v3157_v43 }
 0x281   : > { %v747_v31 = vpop.f32.mrb[2].mxu1 }
 0x282   : > { %v748_v32 = vadd.f32 %v3836_v30, %v747_v31  ;;  %v2852_v33 = vpop.f32.mrb[3].mxu1 }
 0x284   : > { %v752_v34 = vsel %vm751_vm5, %v748_v32, -inf }
 0x285   : > { %753 = vmax.xlane.f32.xlu0 %v752_v34 }
 0x312   : > { %v754_v35 = vpop.xlane.xlu0 %753 }
 0x313   : > { %v755_v36 = vsub.f32 %v748_v32, %v754_v35 }
 0x315   : > { %v756_v37 = vmul.f32 1.442695, %v755_v36 }
 0x317   : > { %3184 = vpow2.f32 %v756_v37 }
 0x321   : > { %v3185_v38 = vpop.eup %3184 }
 0x322   : > { %v758_v39 = vsel %vm751_vm5, %v3185_v38, 0.0 }
 0x323   : > { %759 = vadd.xlane.f32.xlu0 %v758_v39 }
 0x339   : > { %845 = vrot.lane.b32.xlu0 %v3822_v25, %s3492_s6 }
 0x3b0   : > { %v760_v40 = vpop.xlane.xlu0 %759 }
 0x3b1   : > { %3186 = vrcp.f32 %v760_v40 }
 0x3b4   : > { %v846_v47 = vpop.permute.xlu0 %845 }
 0x3bb   : > { %v3187_v44 = vpop.eup %3186 }
 0x3bc   : > { %v762_v45 = vmul.f32 %v3187_v44, %v3185_v38 }
 0x3be   : > { %2858 = vmatmul.mubr.msk.f32.vlgmr.msra.gmra.mrb[4].mxu1 %vm751_vm5, %v762_v45 }
 0x3bf   : > { %2991 = vmatpush3.bf16.xpose.msk.msra.mxu1 %vm3807_vm4, %v2989_v46  ;;  %2864 = vmatprep.mubr.msk.f32.mxu1 %vm3489_vm0, %v3490_v1 }
 0x3c0   : > { %2999 = vmatprep.subr.bf16.mxu1 %v3488_v0 }
 0x3c6   : > { %2865 = vmatmul.mubr.msk.f32.vlgmr.msra.gmra.mrb[6].mxu1 %vm578_vm1, %v846_v47 }
 0x3c7   : > { %2885 = vmatprep.mubr.msk.f32.mxu1 %vm3489_vm0, %v3490_v1 }
 0x491   : > { %v3852_v48 = vpop.f32.mrb[4].mxu1 }
 0x492   : > { %v2859_v49 = vpop.f32.mrb[5].mxu1 }
 0x499   : > { %v925_v50 = vpop.f32.mrb[6].mxu1 }
 0x49a   : > { %v926_v51 = vadd.f32 %v3836_v30, %v925_v50  ;;  %v2866_v52 = vpop.f32.mrb[7].mxu1 }
 0x49c   : > { %v929_v53 = vsel %vm751_vm5, %v926_v51, -inf }
 0x49d   : > { %930 = vmax.xlane.f32.xlu1 %v929_v53 }
 0x4ae   : > { %3160 = vrot.lane.b32.xlu1 %v3813_v22, %s3493_s23 }
 0x4b2   : > { %1026 = vrot.lane.b32.xlu1 %v3822_v25, %s3494_s16 }
 0x52a   : > { %v931_v54 = vpop.xlane.xlu1 %930 }
 0x52b   : > { %v932_v55 = vsub.f32 %v926_v51, %v931_v54  ;;  %v1390_v54 = vld [vmem:[%s4109_s9] sm:$0xff] }
 0x52d   : > { %v933_v56 = vmul.f32 1.442695, %v932_v55  ;;  %v1391_v55 = vld [vmem:[%s4109_s9 + $0x8] sm:$0xff] }
 0x52e   : > { %v3161_v57 = vpop.permute.xlu1 %3160 }
 0x52f   : > { %3188 = vpow2.f32 %v933_v56  ;;  %v3163_v58 = vunpack.i.h.bf16 %v3161_v57  ;;  %v3162_v59 = vunpack.i.l.bf16 %v3161_v57  ;;  %v3010_v56 = vpack.c.bf16 %v1391_v55, %v1390_v54  ;;  %v1392_v57 = vld [vmem:[%s4109_s9 + $0x10] sm:$0xff] }
 0x531   : > { %v2993_v60 = vpack.c.bf16 %v3163_v58, %v3162_v59 }
 0x532   : > { %v1027_v8 = vpop.permute.xlu1 %1026 }
 0x533   : > { %2994 = vmatpush3.bf16.msra.mxu0 %v2993_v60 }
 0x534   : > { %2995 = vmatprep.subr.bf16.mxu0 %v3488_v0 }
 0x539   : > { %v3189_v61 = vpop.eup %3188 }
 0x53a   : > { %v935_v62 = vsel %vm751_vm5, %v3189_v61, 0.0 }
 0x53b   : > { %936 = vadd.xlane.f32.xlu0 %v935_v62 }
 0x551   : > { %3165 = vrot.lane.b32.xlu0 %v3813_v22, %s3494_s16 }
 0x5c8   : > { %v937_v63 = vpop.xlane.xlu0 %936 }
 0x5c9   : > { %3190 = vrcp.f32 %v937_v63 }
 0x5cc   : > { %v3166_v2 = vpop.permute.xlu0 %3165 }
 0x5cd   : > { %v3168_v3 = vunpack.i.h.bf16 %v3166_v2  ;;  %v3167_v4 = vunpack.i.l.bf16 %v3166_v2  ;;  %v842_v2 = vadd.f32 %v3852_v48, %v3822_v25 }
 0x5cf   : > { %v2996_v7 = vpack.c.bf16 %v3168_v3, %v3167_v4 }
 0x5d3   : > { %v3191_v5 = vpop.eup %3190 }
 0x5d4   : > { %v939_v6 = vmul.f32 %v3191_v5, %v3189_v61 }
 0x5d6   : > { %2872 = vmatmul.mubr.msk.f32.vlgmr.msra.gmra.mrb[2].mxu0 %vm751_vm5, %v939_v6 }
 0x5d7   : > { %2998 = vmatpush3.bf16.xpose.msk.msra.mxu0 %vm3807_vm4, %v2996_v7  ;;  %2878 = vmatprep.mubr.msk.f32.mxu0 %vm3489_vm0, %v3490_v1 }
 0x5d8   : > { %3006 = vmatprep.subr.bf16.mxu0 %v3488_v0 }
 0x5de   : > { %2879 = vmatmul.mubr.msk.f32.vlgmr.msra.gmra.mrb[4].mxu0 %vm578_vm1, %v1027_v8 }
 0x5df   : > { %2899 = vmatprep.mubr.msk.f32.mxu0 %vm3489_vm0, %v3490_v1 }
 0x6a9   : > { %v3873_v9 = vpop.f32.mrb[2].mxu0 }
 0x6aa   : > { %v2873_v10 = vpop.f32.mrb[3].mxu0 }
 0x6ab   : > { %v1476_v10 = vld [vmem:[#allocation12] sm:$0xff] }
 0x6b1   : > { %v1106_v11 = vpop.f32.mrb[4].mxu0 }
 0x6b2   : > { %v1107_v12 = vadd.f32 %v3836_v30, %v1106_v11  ;;  %v2880_v13 = vpop.f32.mrb[5].mxu0  ;;  %v1477_v11 = vld [vmem:[#allocation12 + $0x8] sm:$0xff] }
 0x6b3   : > { %v3016_v48 = vpack.c.bf16 %v1477_v11, %v1476_v10  ;;  %v1479_v13 = vld [vmem:[#allocation12 + $0x18] sm:$0xff] }
 0x6b4   : > { %v1110_v14 = vsel %vm751_vm5, %v1107_v12, -inf }
 0x6b5   : > { %1111 = vmax.xlane.f32.xlu1 %v1110_v14 }
 0x6c6   : > { %3170 = vrot.lane.b32.xlu1 %v3813_v22, %s3495_s17 }
 0x6ca   : > { %1207 = vrot.lane.b32.xlu1 %v3822_v25, %s3496_s28 }
 0x742   : > { %v1112_v15 = vpop.xlane.xlu1 %1111 }
 0x743   : > { %v1113_v16 = vsub.f32 %v1107_v12, %v1112_v15  ;;  %v1478_v12 = vld [vmem:[#allocation12 + $0x10] sm:$0xff] }
 0x744   : > { %v3019_v14 = vpack.c.bf16 %v1479_v13, %v1478_v12 }
 0x745   : > { %v1114_v17 = vmul.f32 1.442695, %v1113_v16 }
 0x746   : > { %v3171_v18 = vpop.permute.xlu1 %3170 }
 0x747   : > { %3192 = vpow2.f32 %v1114_v17  ;;  %v3173_v23 = vunpack.i.h.bf16 %v3171_v18  ;;  %v3172_v24 = vunpack.i.l.bf16 %v3171_v18 }
 0x749   : > { %v3000_v26 = vpack.c.bf16 %v3173_v23, %v3172_v24  ;;  %v2722_v24 = vld [vmem:[#allocation13] ss:$0 sm:$0xff] }
 0x74a   : > { %v1208_v37 = vpop.permute.xlu1 %1207 }
 0x74b   : > { %3001 = vmatpush3.bf16.msra.mxu1 %v3000_v26 }
 0x74c   : > { %3002 = vmatprep.subr.bf16.mxu1 %v3488_v0 }
 0x751   : > { %v3193_v27 = vpop.eup %3192 }
 0x752   : > { %v1116_v28 = vsel %vm751_vm5, %v3193_v27, 0.0 }
 0x753   : > { %1117 = vadd.xlane.f32.xlu0 %v1116_v28 }
 0x769   : > { %3175 = vrot.lane.b32.xlu0 %v3813_v22, %s3496_s28 }
 0x7e0   : > { %v1118_v29 = vpop.xlane.xlu0 %1117 }
 0x7e1   : > { %3194 = vrcp.f32 %v1118_v29 }
 0x7e4   : > { %v3176_v31 = vpop.permute.xlu0 %3175 }
 0x7e5   : > { %v3178_v32 = vunpack.i.h.bf16 %v3176_v31  ;;  %v3177_v33 = vunpack.i.l.bf16 %v3176_v31 }
 0x7e7   : > { %v3003_v36 = vpack.c.bf16 %v3178_v32, %v3177_v33 }
 0x7eb   : > { %v3195_v34 = vpop.eup %3194 }
 0x7ec   : > { %v1120_v35 = vmul.f32 %v3195_v34, %v3193_v27 }
 0x7ee   : > { %2886 = vmatmul.mubr.msk.f32.vlgmr.msra.gmra.mrb[8].mxu1 %vm751_vm5, %v1120_v35 }
 0x7ef   : > { %3005 = vmatpush3.bf16.xpose.msk.msra.mxu1 %vm3807_vm4, %v3003_v36  ;;  %2892 = vmatprep.mubr.msk.f32.mxu1 %vm3489_vm0, %v3490_v1 }
 0x7f0   : > { %3015 = vmatprep.subr.bf16.mxu1 %v3488_v0 }
 0x7f6   : > { %2893 = vmatmul.mubr.msk.f32.vlgmr.msra.gmra.mrb[10].mxu1 %vm578_vm1, %v1208_v37 }
 0x7f7   : > { %2921 = vmatprep.mubr.msk.f32.mxu1 %vm3489_vm0, %v3490_v1  ;;  %3017 = vmatpush3.bf16.msra.mxu1 %v3016_v48 }
 0x7f8   : > { %3018 = vmatprep.subr.bf16.mxu1 %v3488_v0 }
 0x7fb   : > { %3020 = vmatpush3.bf16.msra.mxu1 %v3019_v14 }
 0x8c1   : > { %v1196_v38 = vpop.f32.mrb[8].mxu1 }
 0x8c2   : > { %v2887_v39 = vpop.f32.mrb[9].mxu1 }
 0x8c9   : > { %v1287_v40 = vpop.f32.mrb[10].mxu1 }
 0x8ca   : > { %v1288_v41 = vadd.f32 %v3836_v30, %v1287_v40  ;;  %v2894_v42 = vpop.f32.mrb[11].mxu1 }
 0x8cc   : > { %v1291_v21 = vsel %vm751_vm5, %v1288_v41, -inf }
 0x8cd   : > { %1292 = vmax.xlane.f32.xlu1 %v1291_v21 }
 0x8de   : > { %3180 = vrot.lane.b32.xlu1 %v3813_v22, %s3497_s24 }
 0x8e2   : > { %1201 = vrot.lane.b32.xlu1 %v1196_v38, %s3498_s19  ;;  %s3502_s19 = smov 64  }
 0x95a   : > { %v1293_v43 = vpop.xlane.xlu1 %1292 }
 0x95b   : > { %v1294_v44 = vsub.f32 %v1288_v41, %v1293_v43 }
 0x95d   : > { %v1295_v45 = vmul.f32 1.442695, %v1294_v44 }
 0x95e   : > { %v3181_v46 = vpop.permute.xlu1 %3180 }
 0x95f   : > { %3196 = vpow2.f32 %v1295_v45  ;;  %v3183_v47 = vunpack.i.h.bf16 %v3181_v46  ;;  %v3182_v49 = vunpack.i.l.bf16 %v3181_v46 }
 0x961   : > { %v3007_v50 = vpack.c.bf16 %v3183_v47, %v3182_v49 }
 0x962   : > { %v1202_v63 = vpop.permute.xlu1 %1201 }
 0x963   : > { %3008 = vmatpush3.bf16.msra.mxu0 %v3007_v50  ;;  %v1204_v4 = vadd.f32 %v1202_v63, %v3822_v25 }
 0x964   : > { %3009 = vmatprep.subr.bf16.mxu0 %v3488_v0 }
 0x969   : > { %v3197_v30 = vpop.eup %3196 }
 0x96a   : > { %v1297_v51 = vsel %vm751_vm5, %v3197_v30, 0.0 }
 0x96b   : > { %1298 = vadd.xlane.f32.xlu0 %v1297_v51 }
 0x981   : > { %1020 = vrot.lane.b32.xlu0 %v3873_v9, %s3499_s29 }
 0x985   : > { %1776 = vrot.lane.b32.xlu0 %v3801_v19, %s3500_s15 }
 0x9f8   : > { %v1299_v22 = vpop.xlane.xlu0 %1298 }
 0x9f9   : > { %3198 = vrcp.f32 %v1299_v22 }
 0x9fc   : > { %v1021_v61 = vpop.permute.xlu0 %1020 }
 0x9fd   : > { %v1023_v62 = vadd.f32 %v1021_v61, %v3822_v25 }
 0x9ff   : > { %v1386_v3 = vsel %vm578_vm1, %v842_v2, %v1023_v62 }
 0xa00   : > { %v1387_v7 = vsel %vm751_vm5, %v1386_v3, %v1204_v4  ;;  %v1777_v32 = vpop.permute.xlu0 %1776 }
 0xa03   : > { %v3199_v52 = vpop.eup %3198 }
 0xa04   : > { %v1301_v53 = vmul.f32 %v3199_v52, %v3197_v30 }
 0xa06   : > { %2900 = vmatmul.mubr.msk.f32.vlgmr.msra.gmra.mrb[6].mxu0 %vm751_vm5, %v1301_v53 }
 0xa07   : > { %2910 = vmatprep.mubr.msk.f32.mxu0 %vm3489_vm0, %v3490_v1  ;;  %3011 = vmatpush3.bf16.msra.mxu0 %v3010_v56  ;;  %v1393_v1 = vld [vmem:[%s4109_s9 + $0x18] sm:$0xff] }
 0xa08   : > { %3012 = vmatprep.subr.bf16.mxu0 %v3488_v0  ;;  %v3013_v58 = vpack.c.bf16 %v1393_v1, %v1392_v57 }
 0xa0b   : > { %3014 = vmatpush3.bf16.msra.mxu0 %v3013_v58 }
 0xad9   : > { %v1377_v59 = vpop.f32.mrb[6].mxu0 }
 0xada   : > { %1382 = vrot.lane.b32.xlu1 %v1377_v59, %s3501_s25  ;;  %v2901_v60 = vpop.f32.mrb[7].mxu0  ;;  %s2757_s25 = sshll.u32 %s3588_s21, 8  ;;  %s4058_s21 = scalar_lea.sflag [#allocation6], %s469_s22 }
 0xade   : > { %1567 = vrot.lane.b32.xlu1 %v3803_v20, %s3502_s19 }
 0xae2   : > { %1569 = vrot.lane.b32.xlu1 %v3801_v19, %s3502_s19 }
 0xae6   : > { %1774 = vrot.lane.b32.xlu1 %v3803_v20, %s3500_s15 }
 0xb4c   : > { %v1383_v5 = vpop.permute.xlu1 %1382 }
 0xb4d   : > { %v1385_v6 = vadd.f32 %v1383_v5, %v3822_v25  ;;  %v2720_v25 = vld [vmem:[%s4110_s10] ss:$0 sm:$0xff] }
 0xb4f   : > { %v1389_v8 = vsel %vm1388_vm6, %v1387_v7, %v1385_v6 }
 0xb50   : > { %2911 = vmatmul.mubr.msk.f32.vlgmr.msra.gmra.mrb[8].mxu0 %vm496_vm2, %v1389_v8  ;;  %v1568_v9 = vpop.permute.xlu1 %1567 }
 0xb51   : > { %2926 = vmatprep.mubr.msk.f32.mxu0 %vm578_vm1, %v1568_v9 }
 0xb54   : > { %v1570_v28 = vpop.permute.xlu1 %1569 }
 0xb58   : > { %v1775_v31 = vpop.permute.xlu1 %1774 }
 0xc23   : > { %v1470_v15 = vpop.f32.mrb[8].mxu0 }
 0xc24   : > { %v1471_v16 = vadd.f32 %v2720_v25, %v1470_v15  ;;  %v2912_v17 = vpop.f32.mrb[9].mxu0 }
 0xc26   : > { %v1474_v18 = vmax.f32 %v1471_v16, 0.0 }
 0xc28   : > { %v1475_v23 = vadd.f32 %v1474_v18, %v1389_v8 }
 0xc2a   : > { %2922 = vmatmul.mubr.msk.f32.vlgmr.msra.gmra.mrb[12].mxu1 %vm496_vm2, %v1475_v23 }
 0xcfd   : > { %v1556_v26 = vpop.f32.mrb[12].mxu1 }
 0xcfe   : > { %v1557_v27 = vadd.f32 %v2722_v24, %v1556_v26  ;;  %v2923_v0 = vpop.f32.mrb[13].mxu1 }
 0xd00   : > { %1561 = vst.msk [vmem:[#allocation3] sm:$0xff] %vm1560_vm7, %v1557_v27 }
 0xd07   : > { %v3939_v29 = vld [vmem:[#allocation3] sm:$0xff] }
 0xd08   : > { %1988 = vrot.lane.b32.xlu1 %v3939_v29, %s3494_s16  ;;  %1779 = vrot.lane.b32.xlu0 %v3939_v29, %s3492_s6  ;;  %s3504_s16 = smov 40  }
 0xd09   : > { %2924 = vmatprep.subr.msk.mxu0 %vm578_vm1, %v3939_v29 }
 0xd0a   : > { %2925 = vmatpush3.xpose.msk.msra.mxu0 %vm578_vm1, %v3939_v29 }
 0xd0c   : > { %1985 = vrot.lane.b32.xlu1 %v3801_v19, %s3503_s12  ;;  %1983 = vrot.lane.b32.xlu0 %v3803_v20, %s3503_s12 }
 0xd0d   : > { %2927 = vmatmul.mubr.msk.f32.vlgmr.msra.gmra.mrb[10].mxu0 %vm578_vm1, %v1570_v28 }
 0xd0e   : > { %2936 = vmatprep.mubr.msk.f32.mxu0 %vm578_vm1, %v1775_v31 }
 0xd10   : > { %2192 = vrot.lane.b32.xlu1 %v3803_v20, %s3504_s16  ;;  %2197 = vrot.lane.b32.xlu0 %v3939_v29, %s3496_s28 }
 0xd14   : > { %2194 = vrot.lane.b32.xlu0 %v3801_v19, %s3504_s16  ;;  %s4149_s16 = sld [smem:[#allocation29_spill]] }
 0xd7a   : > { %v1989_v33 = vpop.permute.xlu1 %1988  ;;  %v1780_v34 = vpop.permute.xlu0 %1779 }
 0xd7b   : > { %2934 = vmatprep.subr.msk.mxu0 %vm578_vm1, %v1780_v34 }
 0xd7c   : > { %2935 = vmatpush3.xpose.msk.msra.mxu0 %vm578_vm1, %v1780_v34 }
 0xd7d   : > { %2944 = vmatprep.subr.msk.mxu0 %vm578_vm1, %v1989_v33 }
 0xd7e   : > { %v1986_v35 = vpop.permute.xlu1 %1985  ;;  %v1984_v36 = vpop.permute.xlu0 %1983 }
 0xd7f   : > { %2937 = vmatmul.mubr.msk.f32.vlgmr.msra.gmra.mrb[12].mxu0 %vm578_vm1, %v1777_v32 }
 0xd80   : > { %2945 = vmatpush3.xpose.msk.msra.mxu0 %vm578_vm1, %v1989_v33  ;;  %2946 = vmatprep.mubr.msk.f32.mxu0 %vm578_vm1, %v1984_v36 }
 0xd82   : > { %v2193_v37 = vpop.permute.xlu1 %2192  ;;  %v2198_v38 = vpop.permute.xlu0 %2197 }
 0xd83   : > { %2947 = vmatmul.mubr.msk.f32.vlgmr.msra.gmra.mrb[14].mxu0 %vm578_vm1, %v1986_v35  ;;  %2954 = vmatprep.subr.msk.mxu0 %vm578_vm1, %v2198_v38 }
 0xd84   : > { %2955 = vmatpush3.xpose.msk.msra.mxu0 %vm578_vm1, %v2198_v38  ;;  %2956 = vmatprep.mubr.msk.f32.mxu0 %vm578_vm1, %v2193_v37 }
 0xd86   : > { %v2195_v39 = vpop.permute.xlu0 %2194 }
 0xd87   : > { %2957 = vmatmul.mubr.msk.f32.vlgmr.msra.gmra.mrb[16].mxu0 %vm578_vm1, %v2195_v39 }
 0xde0   : > { %v2928_v40 = vpop.f32.mrb[10].mxu0 }
 0xde1   : > { %v1644_v41 = vpop.f32.mrb[11].mxu0  ;;  %v1656_v42 = vsel %vm578_vm1, %v2928_v40, -inf }
 0xde2   : > { %1657 = vmax.xlane.f32.xlu0 %v1656_v42  ;;  %v1653_v21 = vsel %vm578_vm1, %v1644_v41, -inf }
 0xde3   : > { %1654 = vmax.xlane.f32.xlu1 %v1653_v21 }
 0xe52   : > { %v2938_v43 = vpop.f32.mrb[12].mxu0 }
 0xe53   : > { %v1853_v44 = vpop.f32.mrb[13].mxu0  ;;  %v1865_v45 = vsel %vm578_vm1, %v2938_v43, -inf }
 0xe54   : > { %1866 = vmax.xlane.f32.xlu1 %v1865_v45  ;;  %v1862_v46 = vsel %vm578_vm1, %v1853_v44, -inf }
 0xe55   : > { %1863 = vmax.xlane.f32.xlu0 %v1862_v46 }
 0xe56   : > { %v2948_v47 = vpop.f32.mrb[14].mxu0 }
 0xe57   : > { %v2062_v49 = vpop.f32.mrb[15].mxu0  ;;  %v2074_v50 = vsel %vm578_vm1, %v2948_v47, -inf }
 0xe58   : > { %2075 = vmax.xlane.f32.xlu1 %v2074_v50  ;;  %v2071_v30 = vsel %vm578_vm1, %v2062_v49, -inf }
 0xe59   : > { %2072 = vmax.xlane.f32.xlu0 %v2071_v30 }
 0xe5a   : > { %v2958_v51 = vpop.f32.mrb[16].mxu0 }
 0xe5b   : > { %v2271_v22 = vpop.f32.mrb[17].mxu0  ;;  %v2283_v52 = vsel %vm578_vm1, %v2958_v51, -inf }
 0xe5c   : > { %2284 = vmax.xlane.f32.xlu1 %v2283_v52  ;;  %v2280_v53 = vsel %vm578_vm1, %v2271_v22, -inf }
 0xe5d   : > { %2281 = vmax.xlane.f32.xlu0 %v2280_v53 }
 0xe6d   : > { %1884 = vrot.lane.b32.xlu1 %v3939_v29, %s3493_s23 }
 0xe6f   : > { %v1658_v54 = vpop.xlane.xlu0 %1657 }
 0xe70   : > { %v1655_v55 = vpop.xlane.xlu1 %1654  ;;  %v1660_v56 = vsub.f32 %v2928_v40, %v1658_v54 }
 0xe71   : > { %v1659_v57 = vsub.f32 %v1644_v41, %v1655_v55 }
 0xe72   : > { %v1663_v1 = vmul.f32 1.442695, %v1660_v56 }
 0xe73   : > { %1675 = vrot.lane.b32.xlu0 %v3939_v29, %s3491_s4  ;;  %v1661_v58 = vmul.f32 1.442695, %v1659_v57  ;;  %s4052_s4 = scalar_lea.hbm %s4149_s16, %s2757_s25 }
 0xe74   : > { %3200 = vpow2.f32 %v1663_v1 }
 0xe75   : > { %3202 = vpow2.f32 %v1661_v58 }
 0xe7e   : > { %v3201_v59 = vpop.eup %3200 }
 0xe7f   : > { %v3203_v60 = vpop.eup %3202  ;;  %v1668_v61 = vsel %vm578_vm1, %v3201_v59, 0.0 }
 0xe80   : > { %v1665_v62 = vsel %vm578_vm1, %v3203_v60, 0.0 }
 0xe91   : > { %1669 = vadd.xlane.f32.xlu1 %v1668_v61 }
 0xe92   : > { %1666 = vadd.xlane.f32.xlu0 %v1665_v62 }
 0xee1   : > { %v1867_v63 = vpop.xlane.xlu1 %1866 }
 0xee2   : > { %v1869_v2 = vsub.f32 %v2938_v43, %v1867_v63  ;;  %v1864_v3 = vpop.xlane.xlu0 %1863 }
 0xee3   : > { %v1868_v4 = vsub.f32 %v1853_v44, %v1864_v3 }
 0xee4   : > { %v1872_v5 = vmul.f32 1.442695, %v1869_v2 }
 0xee5   : > { %v1870_v6 = vmul.f32 1.442695, %v1868_v4  ;;  %v2076_v7 = vpop.xlane.xlu1 %2075 }
 0xee6   : > { %3204 = vpow2.f32 %v1872_v5  ;;  %v2078_v8 = vsub.f32 %v2948_v47, %v2076_v7  ;;  %v2073_v9 = vpop.xlane.xlu0 %2072 }
 0xee7   : > { %3206 = vpow2.f32 %v1870_v6  ;;  %v2077_v10 = vsub.f32 %v2062_v49, %v2073_v9  ;;  %v2744_v9 = vld [vmem:[%s4109_s9 + $0x20] sm:$0xff] }
 0xee8   : > { %v2081_v11 = vmul.f32 1.442695, %v2078_v8 }
 0xee9   : > { %v2079_v48 = vmul.f32 1.442695, %v2077_v10  ;;  %v2285_v12 = vpop.xlane.xlu1 %2284  ;;  %v2745_v10 = vld [vmem:[%s4109_s9 + $0x28] sm:$0xff] }
 0xeea   : > { %3208 = vpow2.f32 %v2081_v11  ;;  %v2287_v13 = vsub.f32 %v2958_v51, %v2285_v12  ;;  %v2282_v14 = vpop.xlane.xlu0 %2281  ;;  %v3021_v11 = vpack.c.bf16 %v2745_v10, %v2744_v9  ;;  %v2747_v12 = vld [vmem:[%s4109_s9 + $0x38] sm:$0xff] }
 0xeeb   : > { %3210 = vpow2.f32 %v2079_v48  ;;  %v2286_v25 = vsub.f32 %v2271_v22, %v2282_v14  ;;  %v2746_v48 = vld [vmem:[%s4109_s9 + $0x30] sm:$0xff] }
 0xeec   : > { %v2290_v15 = vmul.f32 1.442695, %v2287_v13  ;;  %3022 = vmatprep.subr.bf16.mxu0 %v3021_v11  ;;  %v3025_v13 = vpack.c.bf16 %v2747_v12, %v2746_v48 }
 0xeed   : > { %v2288_v16 = vmul.f32 1.442695, %v2286_v25  ;;  %v1885_v23 = vpop.permute.xlu1 %1884  ;;  %3024 = vmatpush3.bf16.msra.mxu0 %v3021_v11 }
 0xeee   : > { %3212 = vpow2.f32 %v2290_v15  ;;  %v1676_v17 = vpop.permute.xlu0 %1675  ;;  %3026 = vmatprep.subr.bf16.mxu0 %v3025_v13 }
 0xeef   : > { %3214 = vpow2.f32 %v2288_v16  ;;  %2929 = vmatprep.subr.mxu1 %v1676_v17 }
 0xef0   : > { %v3205_v18 = vpop.eup %3204  ;;  %2930 = vmatpush3.msra.mxu1 %v1676_v17 }
 0xef1   : > { %v3207_v24 = vpop.eup %3206  ;;  %2939 = vmatprep.subr.mxu1 %v1885_v23  ;;  %v1877_v26 = vsel %vm578_vm1, %v3205_v18, 0.0  ;;  %3028 = vmatpush3.bf16.msra.mxu0 %v3025_v13 }
 0xef2   : > { %1878 = vadd.xlane.f32.xlu1 %v1877_v26  ;;  %v1874_v27 = vsel %vm578_vm1, %v3207_v24, 0.0 }
 0xef3   : > { %1875 = vadd.xlane.f32.xlu0 %v1874_v27 }
 0xef4   : > { %v3209_v0 = vpop.eup %3208 }
 0xef5   : > { %v3211_v28 = vpop.eup %3210  ;;  %v2086_v31 = vsel %vm578_vm1, %v3209_v0, 0.0 }
 0xef6   : > { %2087 = vadd.xlane.f32.xlu1 %v2086_v31  ;;  %v2083_v32 = vsel %vm578_vm1, %v3211_v28, 0.0 }
 0xef7   : > { %2084 = vadd.xlane.f32.xlu0 %v2083_v32 }
 0xef8   : > { %v3213_v33 = vpop.eup %3212 }
 0xef9   : > { %v3215_v34 = vpop.eup %3214  ;;  %v2295_v35 = vsel %vm578_vm1, %v3213_v33, 0.0 }
 0xefa   : > { %2296 = vadd.xlane.f32.xlu1 %v2295_v35  ;;  %v2292_v36 = vsel %vm578_vm1, %v3215_v34, 0.0 }
 0xefb   : > { %2293 = vadd.xlane.f32.xlu0 %v2292_v36 }
 0xf0b   : > { %2093 = vrot.lane.b32.xlu1 %v3939_v29, %s3495_s17 }
 0xf11   : > { %2302 = vrot.lane.b32.xlu0 %v3939_v29, %s3497_s24 }
 0xf1e   : > { %v1670_v37 = vpop.xlane.xlu1 %1669 }
 0xf1f   : > { %3216 = vrcp.f32 %v1670_v37  ;;  %v1667_v38 = vpop.xlane.xlu0 %1666 }
 0xf20   : > { %3218 = vrcp.f32 %v1667_v38 }
 0xf29   : > { %v3217_v39 = vpop.eup %3216 }
 0xf2a   : > { %v3219_v40 = vpop.eup %3218  ;;  %v1674_v42 = vmul.f32 %v3217_v39, %v3201_v59 }
 0xf2b   : > { %v1673_v41 = vmul.f32 %v3219_v40, %v3203_v60 }
 0xf2d   : > { %2931 = vmatprep.mubr.msk.f32.mxu1 %vm578_vm1, %v1673_v41 }
 0xf2e   : > { %2932 = vmatmul.mubr.msk.f32.vlgmr.msra.gmra.mrb[14].mxu1 %vm578_vm1, %v1674_v42 }
 0xf2f   : > { %2940 = vmatpush3.msra.mxu1 %v1885_v23 }
 0xf7f   : > { %v1879_v21 = vpop.xlane.xlu1 %1878 }
 0xf80   : > { %3220 = vrcp.f32 %v1879_v21  ;;  %v1876_v43 = vpop.xlane.xlu0 %1875  ;;  %v2749_v21 = vld [vmem:[%s4110_s10 + $0x1] ss:$0 sm:$0xff] }
 0xf81   : > { %3222 = vrcp.f32 %v1876_v43 }
 0xf83   : > { %v2088_v44 = vpop.xlane.xlu1 %2087 }
 0xf84   : > { %3224 = vrcp.f32 %v2088_v44  ;;  %v2085_v29 = vpop.xlane.xlu0 %2084 }
 0xf85   : > { %3226 = vrcp.f32 %v2085_v29 }
 0xf87   : > { %v2297_v45 = vpop.xlane.xlu1 %2296 }
 0xf88   : > { %3228 = vrcp.f32 %v2297_v45  ;;  %v2294_v46 = vpop.xlane.xlu0 %2293 }
 0xf89   : > { %3230 = vrcp.f32 %v2294_v46 }
 0xf8a   : > { %v3221_v47 = vpop.eup %3220 }
 0xf8b   : > { %v3223_v49 = vpop.eup %3222  ;;  %v2094_v50 = vpop.permute.xlu1 %2093  ;;  %v1883_v51 = vmul.f32 %v3221_v47, %v3205_v18 }
 0xf8c   : > { %2949 = vmatprep.subr.mxu1 %v2094_v50  ;;  %v1882_v30 = vmul.f32 %v3223_v49, %v3207_v24  ;;  %v2303_v53 = vpop.permute.xlu0 %2302 }
 0xf8e   : > { %v3225_v22 = vpop.eup %3224  ;;  %2941 = vmatprep.mubr.msk.f32.mxu1 %vm578_vm1, %v1882_v30 }
 0xf8f   : > { %v3227_v52 = vpop.eup %3226  ;;  %2942 = vmatmul.mubr.msk.f32.vlgmr.msra.gmra.mrb[16].mxu1 %vm578_vm1, %v1883_v51  ;;  %v2092_v55 = vmul.f32 %v3225_v22, %v3209_v0 }
 0xf90   : > { %2950 = vmatpush3.msra.mxu1 %v2094_v50  ;;  %v2091_v54 = vmul.f32 %v3227_v52, %v3211_v28 }
 0xf91   : > { %2959 = vmatprep.subr.mxu1 %v2303_v53 }
 0xf92   : > { %v3229_v56 = vpop.eup %3228  ;;  %2951 = vmatprep.mubr.msk.f32.mxu1 %vm578_vm1, %v2091_v54 }
 0xf93   : > { %v3231_v57 = vpop.eup %3230  ;;  %2952 = vmatmul.mubr.msk.f32.vlgmr.msra.gmra.mrb[18].mxu1 %vm578_vm1, %v2092_v55  ;;  %v2301_v58 = vmul.f32 %v3229_v56, %v3213_v33 }
 0xf94   : > { %2960 = vmatpush3.msra.mxu1 %v2303_v53  ;;  %v2300_v1 = vmul.f32 %v3231_v57, %v3215_v34 }
 0xf96   : > { %2961 = vmatprep.mubr.msk.f32.mxu1 %vm578_vm1, %v2300_v1 }
 0xf97   : > { %2962 = vmatmul.mubr.msk.f32.vlgmr.msra.gmra.mrb[20].mxu1 %vm578_vm1, %v2301_v58 }
0x1001   : > { %v2933_v59 = vpop.f32.mrb[14].mxu1 }
0x1002   : > { %1763 = vrot.lane.b32.xlu1 %v2933_v59, %s3502_s19  ;;  %v1750_v60 = vpop.f32.mrb[15].mxu1 }
0x1006   : > { %1761 = vrot.lane.b32.xlu1 %v1750_v60, %s3502_s19 }
0x1062   : > { %v2943_v61 = vpop.f32.mrb[16].mxu1 }
0x1063   : > { %1972 = vrot.lane.b32.xlu0 %v2943_v61, %s3497_s24  ;;  %v1959_v62 = vpop.f32.mrb[17].mxu1 }
0x1066   : > { %v2953_v63 = vpop.f32.mrb[18].mxu1 }
0x1067   : > { %1970 = vrot.lane.b32.xlu0 %v1959_v62, %s3497_s24  ;;  %v2168_v2 = vpop.f32.mrb[19].mxu1 }
0x1068   : > { %2179 = vrot.lane.b32.xlu1 %v2168_v2, %s3495_s17 }
0x106a   : > { %v2963_v3 = vpop.f32.mrb[20].mxu1 }
0x106b   : > { %2181 = vrot.lane.b32.xlu0 %v2953_v63, %s3495_s17  ;;  %v2377_v4 = vpop.f32.mrb[21].mxu1  ;;  %s3505_s17 = smov [#allocation15]  }
0x106c   : > { %2388 = vrot.lane.b32.xlu1 %v2377_v4, %s3493_s23  ;;  %s3404_s28 = sshll.u32 %s3505_s17, 4  ;;  %s3405_s28 = int_to_ptr.vmem [resolvable:$false] %s3404_s28 }
0x106f   : > { %2390 = vrot.lane.b32.xlu0 %v2963_v3, %s3493_s23  ;;  %s3406_s23 = scalar_lea.vmem %s3405_s28, 512 }
0x1074   : > { %v1764_v5 = vpop.permute.xlu1 %1763 }
0x1075   : > { %v1768_v8 = vadd.f32 %v1764_v5, %v3801_v19 }
0x1078   : > { %v1762_v6 = vpop.permute.xlu1 %1761 }
0x1079   : > { %v1767_v7 = vadd.f32 %v1762_v6, %v3803_v20 }
0x107b   : > { %2398 = vrot.lane.b32.xlu1 %v1767_v7, %s3502_s19 }
0x107f   : > { %2400 = vrot.lane.b32.xlu1 %v1768_v8, %s3502_s19 }
0x10d5   : > { %v1973_v14 = vpop.permute.xlu0 %1972 }
0x10d6   : > { %v1977_v25 = vadd.f32 %v1973_v14, %v3801_v19 }
0x10d8   : > { %2408 = vrot.lane.b32.xlu0 %v1977_v25, %s3502_s19 }
0x10d9   : > { %v1971_v15 = vpop.permute.xlu0 %1970 }
0x10da   : > { %v1976_v16 = vadd.f32 %v1971_v15, %v3803_v20  ;;  %v2180_v17 = vpop.permute.xlu1 %2179 }
0x10db   : > { %v2185_v18 = vadd.f32 %v2180_v17, %v3803_v20 }
0x10dc   : > { %2406 = vrot.lane.b32.xlu0 %v1976_v16, %s3502_s19 }
0x10dd   : > { %v2182_v23 = vpop.permute.xlu0 %2181  ;;  %2414 = vrot.lane.b32.xlu1 %v2185_v18, %s3502_s19 }
0x10de   : > { %v2186_v24 = vadd.f32 %v2182_v23, %v3801_v19  ;;  %v2389_v26 = vpop.permute.xlu1 %2388 }
0x10df   : > { %v2394_v27 = vadd.f32 %v2389_v26, %v3803_v20 }
0x10e0   : > { %2416 = vrot.lane.b32.xlu0 %v2186_v24, %s3502_s19 }
0x10e1   : > { %v2391_v0 = vpop.permute.xlu0 %2390  ;;  %2422 = vrot.lane.b32.xlu1 %v2394_v27, %s3502_s19 }
0x10e2   : > { %v2395_v28 = vadd.f32 %v2391_v0, %v3801_v19 }
0x10e4   : > { %2424 = vrot.lane.b32.xlu0 %v2395_v28, %s3502_s19  ;;  %s471_s19 = scalar_lea.vmem [#allocation15], %s2695_s11 }
0x10e5   : > { %s2548_s15 = sshll.u32 %s471_s19, 4  ;;  %s4054_s15 = int_to_ptr.vmem [resolvable:$true] %s2548_s15 }
0x10e6   : > { %s3400_s6 = scalar_lea.vmem %s4054_s15, 256  ;;  %p3407_p1 = scmp.lt.s32.totalorder %s4054_s15, %s3405_s28 }
0x10e7   : > { %p3401_p7 = scmp.ne.s32.totalorder %s4054_s15, %s3400_s6  ;;  %p3408_p0 = scmp.lt.s32.totalorder %s3406_s23, %s3400_s6 }
0x10e9   : > { %p3402_p11 = pnand %p3401_p7, %p4150_p8  ;;  %p3409_p6 = por %p3408_p0, %p3407_p1 }
0x10eb   : > { %p3403_p13 = pneg %p3402_p11 }
0x10ed   : > { %v2399_v31 = vpop.permute.xlu1 %2398  ;;  %p3410_p5 = pnand %p3409_p6, %p3403_p13 }
0x10f1   : > { %v2401_v33 = vpop.permute.xlu1 %2400 }
0x114a   : > { %v2409_v32 = vpop.permute.xlu0 %2408 }
0x114b   : > { %v2429_v40 = vsel %vm578_vm1, %v2401_v33, %v2409_v32 }
0x114e   : > { %v2407_v34 = vpop.permute.xlu0 %2406 }
0x114f   : > { %v2415_v35 = vpop.permute.xlu1 %2414  ;;  %v2428_v36 = vsel %vm578_vm1, %v2399_v31, %v2407_v34 }
0x1150   : > { %v2430_v20 = vsel %vm751_vm5, %v2428_v36, %v2415_v35 }
0x1152   : > { %v2417_v37 = vpop.permute.xlu0 %2416 }
0x1153   : > { %v2423_v38 = vpop.permute.xlu1 %2422  ;;  %v2431_v19 = vsel %vm751_vm5, %v2429_v40, %v2417_v37 }
0x1154   : > { %v2432_v39 = vsel %vm1388_vm6, %v2430_v20, %v2423_v38 }
0x1155   : > { %2972 = vmatprep.mubr.msk.f32.mxu0 %vm496_vm2, %v2432_v39 }
0x1156   : > { %v2425_v41 = vpop.permute.xlu0 %2424 }
0x1157   : > { %v2433_v42 = vsel %vm1388_vm6, %v2431_v19, %v2425_v41 }
0x1158   : > { %2973 = vmatmul.mubr.msk.f32.vlgmr.msra.gmra.mrb[18].mxu0 %vm496_vm2, %v2433_v42 }
0x122b   : > { %v2974_v43 = vpop.f32.mrb[18].mxu0 }
0x122c   : > { %v2525_v44 = vadd.f32 %v2974_v43, %v2749_v21  ;;  %v2519_v29 = vpop.f32.mrb[19].mxu0 }
0x122d   : > { %v2520_v45 = vadd.f32 %v2749_v21, %v2519_v29 }
0x122e   : > { %v2529_v46 = vmax.f32 %v2525_v44, 0.0 }
0x122f   : > { %v2528_v47 = vmax.f32 %v2520_v45, 0.0 }
0x1230   : > { %v2531_v49 = vadd.f32 %v2529_v46, %v2433_v42 }
0x1231   : > { %v2530_v50 = vadd.f32 %v2528_v47, %v2432_v39 }
0x1232   : > { %2533 = vst.msk [vmem:[%s471_s19 + $0x8] sm:$0xff] %vm496_vm2, %v2531_v49 }
0x1233   : > { %2532 = vst.msk [vmem:[%s471_s19] sm:$0xff] %vm496_vm2, %v2530_v50 }
0x1234   : > { %3413 = shalt.err (!%p3410_p5)
}
0x1235   : > { %s3414_s24 = scalar_lea.hbm %s4052_s4, 256  ;;  %s3418_s22 = scalar_lea.hbm %s4149_s16, 512 }
0x1236   : > { %p3415_p9 = scmp.ne.s32.totalorder %s4052_s4, %s3414_s24  ;;  %p3419_p2 = scmp.lt.u32.totalorder %s4052_s4, %s4149_s16 }
0x1237   : > { %p3420_p3 = scmp.lt.u32.totalorder %s3418_s22, %s3414_s24  ;;  %p3422_p7 = scmp.lt.u32.totalorder %s3414_s24, %s4052_s4 }
0x1238   : > { %p3416_p12 = pnand %p3415_p9, %p4150_p8 }
0x1239   : > { %p3421_p4 = por %p3420_p3, %p3419_p2 }
0x123a   : > { %p3417_p10 = pneg %p3416_p12 }
0x123b   : > { %p3423_p11 = por %p3422_p7, %p3421_p4 }
0x123d   : > { %p3424_p13 = pnand %p3423_p11, %p3417_p10 }
0x123f   : > { %3427 = shalt.err (!%p3424_p13)
}
0x1240   : > { %s3506_s26 = smov 128  }
0x1241   : > { %3053 = dma.vmem_to_hbm [thread:$0]  (%p4150_p8), %s4054_s15, 256, %s4052_s4, %s4058_s21, %s3506_s26, %s3506_s26, %s3499_s29  }
0x1242 PF: > { %s4151_s25 = sld [smem:[#allocation23_spill]]  ;;  %s4152_s19 = sld [smem:[#allocation21_spill]] }
0x1243   : > { %s4153_s13 = sld [smem:[#allocation26_spill]] }
0x1248   : > { %p3090_p1 = scmp.ge.s32.totalorder %s4151_s25, 2  ;;  %s2563_s12 = sand.u32 1, %s4152_s19  }
0x1249   : > { %p4154_p0 = scmp.ne.s32.totalorder %s4153_s13, 0  ;;  %s2564_s6 = scalar_lea.sflag [#allocation6], %s2563_s12 }
0x124b   : > { %p3075_p6 = pnand %p3090_p1, %p4154_p0 }
0x124d   : > { %3461 = dma.done.wait (!%p3075_p6), %s2564_s6, 256  }
0x124e   : > { %3463 = vsyncadd (!%p3075_p6), %s2564_s6, 4294967040  ;;  %s4155_s20 = sld [smem:[#allocation24_spill]]  ;;  %s4156_s28 = sld [smem:[#allocation22_spill]] }
0x124f   : > { %s4157_s19 = sld [smem:[#allocation25_spill]]  ;;  %s4158_s17 = smov %s3470_s18 }
0x1254   : > { %p25_p5 = scmp.ge.s32.totalorder %s4155_s20, 4   ;;  %s4159_s18 = smov %s4156_s28 }
0x1256   :  { %27 = sbr.rel (!%p25_p5) target bundleno = 11 (0xb), region = 129 }
0x125d   :  { %2569 = vsyncpa [#allocation5], 1 }
0x125e   :  { %2571 = vsyncpa [#allocation5 + $0x1], 1 }
0x125f   :  { %2572 = vsyncpa [#allocation8], 1 }
0x1260   :  { %2573 = vsyncpa [#allocation11], 1 }
0x1261   :  { %2574 = vsyncpa [#allocation14], 1 }
0x1262   :  { %2575 = vsyncpa [#allocation6], 1 }
0x1263   :  { %2577 = vsyncpa [#allocation6 + $0x1], 1 }

</bundles_post_ra>
